<compile_context>
chip_gen: v6e
topology: v6e:2x2x1
jax: 0.10.0
libtpu: 0.0.40
codegen_flags: <defaults>
</compile_context>

<pallas_src>
import jax
import jax.numpy as jnp
from jax import lax
from jax.experimental import pallas as pl
from jax.experimental.pallas import tpu as pltpu


def _layernorm(v, gamma, beta, eps=1e-5):
    # v: (rows, C) f32, gamma/beta: (1, C) f32
    mu = jnp.mean(v, axis=-1, keepdims=True)
    var = jnp.mean((v - mu) ** 2, axis=-1, keepdims=True)
    return (v - mu) * lax.rsqrt(var + eps) * gamma + beta


def decoder_layer_kernel(
    x_ref,                        # (T, C)   full sequence for this batch element
    wq_ref, wk_ref, wv_ref,       # (H, C, hs) bf16 each (head-batched)
    wo_ref, bo_ref,               # (H, hs, C) bf16, (1, C) f32
    ln1_g_ref, ln1_b_ref,         # (1, C), (1, C) f32
    ln2_g_ref, ln2_b_ref,         # (1, C), (1, C) f32
    w1_ref, b1_ref,               # (C, 4C) bf16, (1, 4C) f32
    w2_ref, b2_ref,               # (4C, C) bf16, (1, C) f32
    o_ref,                        # (TQ, C)  current query tile of the output
):
    bf16 = jnp.bfloat16
    f32 = jnp.float32

    xf = x_ref[...].astype(f32)                  # (T, C) full sequence
    T, C = xf.shape
    H, _, hs = wq_ref.shape
    TQ = o_ref.shape[0]
    scale = float(C) ** (-0.5)                   # C == n_embd, as in reference

    qs = pl.multiple_of(pl.program_id(1) * TQ, TQ)   # query-tile row offset
    xq = x_ref[pl.ds(qs, TQ), :].astype(f32)         # (TQ, C) residual rows

    ln1_g = ln1_g_ref[...]
    ln1_b = ln1_b_ref[...]

    # ---- sublayer 1: x = x + MHA(LN1(x)) ----
    xln1_f = _layernorm(xf, ln1_g, ln1_b)        # (T, C)  -> keys / values
    xln1_q = _layernorm(xq, ln1_g, ln1_b)        # (TQ, C) -> queries

    # Head-batched projections: no lane-splitting slices, no concatenate.
    qb = jnp.broadcast_to(xln1_q.astype(bf16)[None], (H, TQ, C))
    kb = jnp.broadcast_to(xln1_f.astype(bf16)[None], (H, T, C))

    q = jnp.einsum("htc,hcd->htd", qb, wq_ref[...],
                   preferred_element_type=f32)               # (H, TQ, hs)
    k = jnp.einsum("htc,hcd->htd", kb, wk_ref[...],
                   preferred_element_type=f32)               # (H, T, hs)
    v = jnp.einsum("htc,hcd->htd", kb, wv_ref[...],
                   preferred_element_type=f32)               # (H, T, hs)

    q = q * scale   # fold C**-0.5 into q (commutes with the QK^T matmul)

    # Scores: contract the last dims directly (no explicit transpose).
    s = jnp.einsum("hqd,hkd->hqk", q.astype(bf16), k.astype(bf16),
                   preferred_element_type=f32)               # (H, TQ, T)

    row = lax.broadcasted_iota(jnp.int32, (H, TQ, T), 1) + qs   # global query idx
    col = lax.broadcasted_iota(jnp.int32, (H, TQ, T), 2)        # key idx
    s = jnp.where(col <= row, s, -jnp.inf)

    s = s - jnp.max(s, axis=-1, keepdims=True)
    p = jnp.exp(s)
    p = p * pl.reciprocal(jnp.sum(p, axis=-1, keepdims=True), approx=True)
    # dropout(p): identity (p_drop = 0 / eval mode)

    attn = jnp.einsum("hqk,hkd->hqd", p.astype(bf16), v.astype(bf16),
                      preferred_element_type=f32)            # (H, TQ, hs)

    # Output projection, head-batched then summed over heads
    # (== concat(heads) @ Wo, without the concatenate).
    proj = jnp.einsum("hqd,hdc->hqc", attn.astype(bf16), wo_ref[...],
                      preferred_element_type=f32)            # (H, TQ, C)
    proj = jnp.sum(proj, axis=0) + bo_ref[...]               # (TQ, C)
    # dropout(proj): identity
    x1 = xq + proj

    # ---- sublayer 2: x = x + FFN(LN2(x)) ----
    xln2 = _layernorm(x1, ln2_g_ref[...], ln2_b_ref[...])
    h1 = jnp.dot(xln2.astype(bf16), w1_ref[...],
                 preferred_element_type=f32) + b1_ref[...]   # (TQ, 4C)
    h1 = jnp.maximum(h1, 0.0)                                # ReLU
    ffn = jnp.dot(h1.astype(bf16), w2_ref[...],
                  preferred_element_type=f32) + b2_ref[...]  # (TQ, C)
    # dropout(ffn): identity
    o_ref[...] = (x1 + ffn).astype(o_ref.dtype)


def decoder_layer(x, params, *, n_heads, q_block=None):
    """x: (B, T, C) float32. params: f32 weights (Linear weights as (in, out))."""
    B, T, C = x.shape
    H = n_heads
    hs = C // H
    TQ = q_block if q_block is not None else min(T, 128)
    assert T % TQ == 0 and (TQ % 8 == 0 or TQ == T), "bad q_block"

    bf16 = jnp.bfloat16
    # Head-batched, bf16 weights (one-time relayout in the wrapper).
    wq_h = params["wq"].reshape(C, H, hs).transpose(1, 0, 2).astype(bf16)  # (H, C, hs)
    wk_h = params["wk"].reshape(C, H, hs).transpose(1, 0, 2).astype(bf16)
    wv_h = params["wv"].reshape(C, H, hs).transpose(1, 0, 2).astype(bf16)
    wo_h = params["wo"].reshape(H, hs, C).astype(bf16)                      # (H, hs, C)
    w1 = params["w1"].astype(bf16)                                          # (C, 4C)
    w2 = params["w2"].astype(bf16)                                          # (4C, C)

    def full_spec(shape):
        n = len(shape)
        return pl.BlockSpec(shape, lambda b, t: (0,) * n)

    in_specs = [
        pl.BlockSpec((None, T, C), lambda b, t: (b, 0, 0)),   # x: full sequence per batch
        full_spec((H, C, hs)), full_spec((H, C, hs)), full_spec((H, C, hs)),  # wq, wk, wv
        full_spec((H, hs, C)), full_spec((1, C)),             # wo, bo
        full_spec((1, C)), full_spec((1, C)),                 # ln1 gamma/beta
        full_spec((1, C)), full_spec((1, C)),                 # ln2 gamma/beta
        full_spec((C, 4 * C)), full_spec((1, 4 * C)),         # w1, b1
        full_spec((4 * C, C)), full_spec((1, C)),             # w2, b2
    ]

    return pl.pallas_call(
        decoder_layer_kernel,
        out_shape=jax.ShapeDtypeStruct((B, T, C), x.dtype),
        grid_spec=pltpu.PrefetchScalarGridSpec(
            num_scalar_prefetch=0,
            grid=(B, T // TQ),
            in_specs=in_specs,
            out_specs=pl.BlockSpec((None, TQ, C), lambda b, t: (b, t, 0)),
        ),
        compiler_params=pltpu.CompilerParams(
            dimension_semantics=("parallel", "parallel"),
            vmem_limit_bytes=64 * 1024 * 1024,
        ),
    )(
        x,
        wq_h, wk_h, wv_h,
        wo_h, params["bo"],
        params["ln1_g"], params["ln1_b"],
        params["ln2_g"], params["ln2_b"],
        w1, params["b1"],
        w2, params["b2"],
    )


def decoder_layer_ref(x, params, *, n_heads):
    """Pure-JAX f32 reference mirroring the PyTorch forward (dropout = identity)."""
    B, T, C = x.shape
    hs = C // n_heads

    def ln(v, g, b):
        mu = jnp.mean(v, axis=-1, keepdims=True)
        var = jnp.mean((v - mu) ** 2, axis=-1, keepdims=True)
        return (v - mu) / jnp.sqrt(var + 1e-5) * g + b

    xln1 = ln(x, params["ln1_g"], params["ln1_b"])
    q = xln1 @ params["wq"]
    k = xln1 @ params["wk"]
    v = xln1 @ params["wv"]
    mask = jnp.tril(jnp.ones((T, T), bool))
    outs = []
    for h in range(n_heads):
        s = h * hs
        qh, kh, vh = q[..., s:s + hs], k[..., s:s + hs], v[..., s:s + hs]
        wei = jnp.einsum("btd,bsd->bts", qh, kh) * (C ** -0.5)
        wei = jnp.where(mask, wei, -jnp.inf)
        wei = jax.nn.softmax(wei, axis=-1)
        outs.append(jnp.einsum("bts,bsd->btd", wei, vh))
    attn = jnp.concatenate(outs, axis=-1) @ params["wo"] + params["bo"]
    x1 = x + attn
    xln2 = ln(x1, params["ln2_g"], params["ln2_b"])
    ffn = jnp.maximum(xln2 @ params["w1"] + params["b1"], 0.0) @ params["w2"] + params["b2"]
    return x1 + ffn


def init_params(key, n_embd):
    C = n_embd
    keys = jax.random.split(key, 10)
    s = 0.02
    return {
        "wq": s * jax.random.normal(keys[0], (C, C), jnp.float32),
        "wk": s * jax.random.normal(keys[1], (C, C), jnp.float32),
        "wv": s * jax.random.normal(keys[2], (C, C), jnp.float32),
        "wo": s * jax.random.normal(keys[3], (C, C), jnp.float32),
        "bo": s * jax.random.normal(keys[4], (1, C), jnp.float32),
        "ln1_g": jnp.ones((1, C), jnp.float32),
        "ln1_b": jnp.zeros((1, C), jnp.float32),
        "ln2_g": jnp.ones((1, C), jnp.float32),
        "ln2_b": jnp.zeros((1, C), jnp.float32),
        "w1": s * jax.random.normal(keys[5], (C, 4 * C), jnp.float32),
        "b1": s * jax.random.normal(keys[6], (1, 4 * C), jnp.float32),
        "w2": s * jax.random.normal(keys[7], (4 * C, C), jnp.float32),
        "b2": s * jax.random.normal(keys[8], (1, C), jnp.float32),
    }


if __name__ == "__main__":
    # Lane-dense demo shapes: block_size = T = 64, n_embd = 128 (multiple of 128),
    # n_heads = 4 -> head_size = 32; grid = (B, T//TQ) = (2, 2).
    B, T, n_embd, n_heads = 2, 64, 128, 4

    key = jax.random.PRNGKey(0)
    kx, kp = jax.random.split(key)
    x = jax.random.normal(kx, (B, T, n_embd), jnp.float32)
    params = init_params(kp, n_embd)

    out = decoder_layer(x, params, n_heads=n_heads, q_block=32)
    out = jax.block_until_ready(out)

    ref = decoder_layer_ref(x, params, n_heads=n_heads)
    assert out.shape == (B, T, n_embd)
    max_err = float(jnp.max(jnp.abs(out - ref)))
    # bf16 matmul operands + approx reciprocal -> looser tolerance vs f32 reference.
    assert jnp.allclose(out, ref, atol=2e-2, rtol=2e-2), max_err
    print("KERNEL_OK")
</pallas_src>

<mosaic_0001>
module attributes {stable_mosaic.version = 11 : i64} {
  func.func @decoder_layer_kernel(%arg0: i32, %arg1: i32, %arg2: memref<1x64x128xf32, #tpu.memory_space<vmem>>, %arg3: memref<4x128x32xbf16, #tpu.memory_space<vmem>>, %arg4: memref<4x128x32xbf16, #tpu.memory_space<vmem>>, %arg5: memref<4x128x32xbf16, #tpu.memory_space<vmem>>, %arg6: memref<4x32x128xbf16, #tpu.memory_space<vmem>>, %arg7: memref<1x128xf32, #tpu.memory_space<vmem>>, %arg8: memref<1x128xf32, #tpu.memory_space<vmem>>, %arg9: memref<1x128xf32, #tpu.memory_space<vmem>>, %arg10: memref<1x128xf32, #tpu.memory_space<vmem>>, %arg11: memref<1x128xf32, #tpu.memory_space<vmem>>, %arg12: memref<128x512xbf16, #tpu.memory_space<vmem>>, %arg13: memref<1x512xf32, #tpu.memory_space<vmem>>, %arg14: memref<512x128xbf16, #tpu.memory_space<vmem>>, %arg15: memref<1x128xf32, #tpu.memory_space<vmem>>, %arg16: memref<1x32x128xf32, #tpu.memory_space<vmem>>) attributes {dimension_semantics = [#tpu.dimension_semantics<parallel>, #tpu.dimension_semantics<parallel>], iteration_bounds = array<i64: 2, 2>, scalar_prefetch = 0 : i64, scratch_operands = 0 : i64, tpu.core_type = #tpu.core_type<tc>, window_params = [{transform_indices = @transform_0, window_bounds = array<i64: 1, 64, 128>}, {pipeline_mode = #tpu.pipeline_mode<synchronous>, transform_indices = @transform_1, window_bounds = array<i64: 4, 128, 32>}, {pipeline_mode = #tpu.pipeline_mode<synchronous>, transform_indices = @transform_2, window_bounds = array<i64: 4, 128, 32>}, {pipeline_mode = #tpu.pipeline_mode<synchronous>, transform_indices = @transform_3, window_bounds = array<i64: 4, 128, 32>}, {pipeline_mode = #tpu.pipeline_mode<synchronous>, transform_indices = @transform_4, window_bounds = array<i64: 4, 32, 128>}, {pipeline_mode = #tpu.pipeline_mode<synchronous>, transform_indices = @transform_5, window_bounds = array<i64: 1, 128>}, {pipeline_mode = #tpu.pipeline_mode<synchronous>, transform_indices = @transform_6, window_bounds = array<i64: 1, 128>}, {pipeline_mode = #tpu.pipeline_mode<synchronous>, transform_indices = @transform_7, window_bounds = array<i64: 1, 128>}, {pipeline_mode = #tpu.pipeline_mode<synchronous>, transform_indices = @transform_8, window_bounds = array<i64: 1, 128>}, {pipeline_mode = #tpu.pipeline_mode<synchronous>, transform_indices = @transform_9, window_bounds = array<i64: 1, 128>}, {pipeline_mode = #tpu.pipeline_mode<synchronous>, transform_indices = @transform_10, window_bounds = array<i64: 128, 512>}, {pipeline_mode = #tpu.pipeline_mode<synchronous>, transform_indices = @transform_11, window_bounds = array<i64: 1, 512>}, {pipeline_mode = #tpu.pipeline_mode<synchronous>, transform_indices = @transform_12, window_bounds = array<i64: 512, 128>}, {pipeline_mode = #tpu.pipeline_mode<synchronous>, transform_indices = @transform_13, window_bounds = array<i64: 1, 128>}, {transform_indices = @transform_14, window_bounds = array<i64: 1, 32, 128>}]} {
    %c0 = arith.constant 0 : index
    %c0_0 = arith.constant 0 : index
    %c0_1 = arith.constant 0 : index
    %0 = vector.load %arg2[%c0, %c0_0, %c0_1] : memref<1x64x128xf32, #tpu.memory_space<vmem>>, vector<1x64x128xf32>
    %1 = vector.shape_cast %0 : vector<1x64x128xf32> to vector<64x128xf32>
    %c32_i32 = arith.constant 32 : i32
    %2 = arith.muli %arg1, %c32_i32 : i32
    %3 = tpu.assume_multiple %2, 32 : i32
    %c0_2 = arith.constant 0 : index
    %4 = arith.index_cast %3 : i32 to index
    %c0_3 = arith.constant 0 : index
    %5 = vector.load %arg2[%c0_2, %4, %c0_3] : memref<1x64x128xf32, #tpu.memory_space<vmem>>, vector<1x32x128xf32>
    %6 = vector.shape_cast %5 : vector<1x32x128xf32> to vector<32x128xf32>
    %c0_4 = arith.constant 0 : index
    %c0_5 = arith.constant 0 : index
    %7 = vector.load %arg8[%c0_4, %c0_5] : memref<1x128xf32, #tpu.memory_space<vmem>>, vector<1x128xf32>
    %c0_6 = arith.constant 0 : index
    %c0_7 = arith.constant 0 : index
    %8 = vector.load %arg9[%c0_6, %c0_7] : memref<1x128xf32, #tpu.memory_space<vmem>>, vector<1x128xf32>
    %cst = arith.constant dense<0.000000e+00> : vector<64xf32>
    %9 = vector.multi_reduction <add>, %1, %cst [1] : vector<64x128xf32> to vector<64xf32>
    %10 = vector.shape_cast %9 : vector<64xf32> to vector<64x1xf32>
    %cst_8 = arith.constant 1.280000e+02 : f32
    %11 = vector.broadcast %cst_8 : f32 to vector<64x1xf32>
    %12 = arith.divf %10, %11 : vector<64x1xf32>
    %13 = vector.broadcast %12 : vector<64x1xf32> to vector<64x128xf32>
    %14 = arith.subf %1, %13 : vector<64x128xf32>
    %15 = arith.mulf %14, %14 : vector<64x128xf32>
    %cst_9 = arith.constant dense<0.000000e+00> : vector<64xf32>
    %16 = vector.multi_reduction <add>, %15, %cst_9 [1] : vector<64x128xf32> to vector<64xf32>
    %17 = vector.shape_cast %16 : vector<64xf32> to vector<64x1xf32>
    %cst_10 = arith.constant 1.280000e+02 : f32
    %18 = vector.broadcast %cst_10 : f32 to vector<64x1xf32>
    %19 = arith.divf %17, %18 : vector<64x1xf32>
    %20 = vector.broadcast %12 : vector<64x1xf32> to vector<64x128xf32>
    %21 = arith.subf %1, %20 : vector<64x128xf32>
    %cst_11 = arith.constant 9.99999974E-6 : f32
    %22 = vector.broadcast %cst_11 : f32 to vector<64x1xf32>
    %23 = arith.addf %19, %22 : vector<64x1xf32>
    %24 = math.rsqrt %23 : vector<64x1xf32>
    %25 = vector.broadcast %24 : vector<64x1xf32> to vector<64x128xf32>
    %26 = arith.mulf %21, %25 : vector<64x128xf32>
    %27 = vector.broadcast %7 : vector<1x128xf32> to vector<64x128xf32>
    %28 = arith.mulf %26, %27 : vector<64x128xf32>
    %29 = vector.broadcast %8 : vector<1x128xf32> to vector<64x128xf32>
    %30 = arith.addf %28, %29 : vector<64x128xf32>
    %cst_12 = arith.constant dense<0.000000e+00> : vector<32xf32>
    %31 = vector.multi_reduction <add>, %6, %cst_12 [1] : vector<32x128xf32> to vector<32xf32>
    %32 = vector.shape_cast %31 : vector<32xf32> to vector<32x1xf32>
    %cst_13 = arith.constant 1.280000e+02 : f32
    %33 = vector.broadcast %cst_13 : f32 to vector<32x1xf32>
    %34 = arith.divf %32, %33 : vector<32x1xf32>
    %35 = vector.broadcast %34 : vector<32x1xf32> to vector<32x128xf32>
    %36 = arith.subf %6, %35 : vector<32x128xf32>
    %37 = arith.mulf %36, %36 : vector<32x128xf32>
    %cst_14 = arith.constant dense<0.000000e+00> : vector<32xf32>
    %38 = vector.multi_reduction <add>, %37, %cst_14 [1] : vector<32x128xf32> to vector<32xf32>
    %39 = vector.shape_cast %38 : vector<32xf32> to vector<32x1xf32>
    %cst_15 = arith.constant 1.280000e+02 : f32
    %40 = vector.broadcast %cst_15 : f32 to vector<32x1xf32>
    %41 = arith.divf %39, %40 : vector<32x1xf32>
    %42 = vector.broadcast %34 : vector<32x1xf32> to vector<32x128xf32>
    %43 = arith.subf %6, %42 : vector<32x128xf32>
    %cst_16 = arith.constant 9.99999974E-6 : f32
    %44 = vector.broadcast %cst_16 : f32 to vector<32x1xf32>
    %45 = arith.addf %41, %44 : vector<32x1xf32>
    %46 = math.rsqrt %45 : vector<32x1xf32>
    %47 = vector.broadcast %46 : vector<32x1xf32> to vector<32x128xf32>
    %48 = arith.mulf %43, %47 : vector<32x128xf32>
    %49 = vector.broadcast %7 : vector<1x128xf32> to vector<32x128xf32>
    %50 = arith.mulf %48, %49 : vector<32x128xf32>
    %51 = vector.broadcast %8 : vector<1x128xf32> to vector<32x128xf32>
    %52 = arith.addf %50, %51 : vector<32x128xf32>
    %53 = arith.truncf %52 : vector<32x128xf32> to vector<32x128xbf16>
    %54 = vector.shape_cast %53 : vector<32x128xbf16> to vector<1x32x128xbf16>
    %55 = vector.shape_cast %54 : vector<1x32x128xbf16> to vector<1x32x128xbf16>
    %56 = vector.broadcast %55 : vector<1x32x128xbf16> to vector<4x32x128xbf16>
    %57 = arith.truncf %30 : vector<64x128xf32> to vector<64x128xbf16>
    %58 = vector.shape_cast %57 : vector<64x128xbf16> to vector<1x64x128xbf16>
    %59 = vector.shape_cast %58 : vector<1x64x128xbf16> to vector<1x64x128xbf16>
    %60 = vector.broadcast %59 : vector<1x64x128xbf16> to vector<4x64x128xbf16>
    %c0_17 = arith.constant 0 : index
    %c0_18 = arith.constant 0 : index
    %c0_19 = arith.constant 0 : index
    %61 = vector.load %arg3[%c0_17, %c0_18, %c0_19] : memref<4x128x32xbf16, #tpu.memory_space<vmem>>, vector<4x128x32xbf16>
    "tpu.trace_start"() <{level = 10 : i32, message = "htc,hcd->htd"}> : () -> ()
    %cst_20 = arith.constant dense<0.000000e+00> : vector<4x32x32xf32>
    %62 = tpu.matmul %56, %61, %cst_20 {dimension_numbers = #tpu.dot_dimension_numbers<[2], [1], [1], [2], [0, 0, 0, 1, 1, 2], [0], [0]>} : vector<4x32x128xbf16>, vector<4x128x32xbf16>, vector<4x32x32xf32> -> vector<4x32x32xf32>
    "tpu.trace_stop"() : () -> ()
    %c0_21 = arith.constant 0 : index
    %c0_22 = arith.constant 0 : index
    %c0_23 = arith.constant 0 : index
    %63 = vector.load %arg4[%c0_21, %c0_22, %c0_23] : memref<4x128x32xbf16, #tpu.memory_space<vmem>>, vector<4x128x32xbf16>
    "tpu.trace_start"() <{level = 10 : i32, message = "htc,hcd->htd"}> : () -> ()
    %cst_24 = arith.constant dense<0.000000e+00> : vector<4x64x32xf32>
    %64 = tpu.matmul %60, %63, %cst_24 {dimension_numbers = #tpu.dot_dimension_numbers<[2], [1], [1], [2], [0, 0, 0, 1, 1, 2], [0], [0]>} : vector<4x64x128xbf16>, vector<4x128x32xbf16>, vector<4x64x32xf32> -> vector<4x64x32xf32>
    "tpu.trace_stop"() : () -> ()
    %c0_25 = arith.constant 0 : index
    %c0_26 = arith.constant 0 : index
    %c0_27 = arith.constant 0 : index
    %65 = vector.load %arg5[%c0_25, %c0_26, %c0_27] : memref<4x128x32xbf16, #tpu.memory_space<vmem>>, vector<4x128x32xbf16>
    "tpu.trace_start"() <{level = 10 : i32, message = "htc,hcd->htd"}> : () -> ()
    %cst_28 = arith.constant dense<0.000000e+00> : vector<4x64x32xf32>
    %66 = tpu.matmul %60, %65, %cst_28 {dimension_numbers = #tpu.dot_dimension_numbers<[2], [1], [1], [2], [0, 0, 0, 1, 1, 2], [0], [0]>} : vector<4x64x128xbf16>, vector<4x128x32xbf16>, vector<4x64x32xf32> -> vector<4x64x32xf32>
    "tpu.trace_stop"() : () -> ()
    %cst_29 = arith.constant 0.0883883461 : f32
    %67 = vector.broadcast %cst_29 : f32 to vector<4x32x32xf32>
    %68 = arith.mulf %62, %67 : vector<4x32x32xf32>
    %69 = arith.truncf %68 : vector<4x32x32xf32> to vector<4x32x32xbf16>
    %70 = arith.truncf %64 : vector<4x64x32xf32> to vector<4x64x32xbf16>
    "tpu.trace_start"() <{level = 10 : i32, message = "hqd,hkd->hqk"}> : () -> ()
    %cst_30 = arith.constant dense<0.000000e+00> : vector<4x32x64xf32>
    %71 = tpu.matmul %69, %70, %cst_30 {dimension_numbers = #tpu.dot_dimension_numbers<[2], [2], [1], [1], [0, 0, 0, 1, 1, 1], [0], [0]>} : vector<4x32x32xbf16>, vector<4x64x32xbf16>, vector<4x32x64xf32> -> vector<4x32x64xf32>
    "tpu.trace_stop"() : () -> ()
    %72 = tpu.iota {dimensions = array<i32: 1>} : vector<4x32x64xi32>
    %73 = vector.broadcast %3 : i32 to vector<4x32x64xi32>
    %74 = arith.addi %72, %73 : vector<4x32x64xi32>
    %75 = tpu.iota {dimensions = array<i32: 2>} : vector<4x32x64xi32>
    %76 = arith.cmpi sle, %75, %74 : vector<4x32x64xi32>
    %cst_31 = arith.constant 0xFF800000 : f32
    %77 = vector.broadcast %cst_31 : f32 to vector<4x32x64xf32>
    %78 = arith.select %76, %71, %77 : vector<4x32x64xi1>, vector<4x32x64xf32>
    %cst_32 = arith.constant dense<0xFF800000> : vector<4x32xf32>
    %79 = vector.multi_reduction <maximumf>, %78, %cst_32 [2] : vector<4x32x64xf32> to vector<4x32xf32>
    %80 = vector.shape_cast %79 : vector<4x32xf32> to vector<4x32x1xf32>
    %81 = vector.broadcast %80 : vector<4x32x1xf32> to vector<4x32x64xf32>
    %82 = arith.subf %78, %81 : vector<4x32x64xf32>
    %83 = math.exp %82 : vector<4x32x64xf32>
    %cst_33 = arith.constant dense<0.000000e+00> : vector<4x32xf32>
    %84 = vector.multi_reduction <add>, %83, %cst_33 [2] : vector<4x32x64xf32> to vector<4x32xf32>
    %85 = vector.shape_cast %84 : vector<4x32xf32> to vector<4x32x1xf32>
    %86 = tpu.reciprocal %85 {approx = true} : vector<4x32x1xf32> -> vector<4x32x1xf32>
    %87 = vector.broadcast %86 : vector<4x32x1xf32> to vector<4x32x64xf32>
    %88 = arith.mulf %83, %87 : vector<4x32x64xf32>
    %89 = arith.truncf %88 : vector<4x32x64xf32> to vector<4x32x64xbf16>
    %90 = arith.truncf %66 : vector<4x64x32xf32> to vector<4x64x32xbf16>
    "tpu.trace_start"() <{level = 10 : i32, message = "hqk,hkd->hqd"}> : () -> ()
    %cst_34 = arith.constant dense<0.000000e+00> : vector<4x32x32xf32>
    %91 = tpu.matmul %89, %90, %cst_34 {dimension_numbers = #tpu.dot_dimension_numbers<[2], [1], [1], [2], [0, 0, 0, 1, 1, 2], [0], [0]>} : vector<4x32x64xbf16>, vector<4x64x32xbf16>, vector<4x32x32xf32> -> vector<4x32x32xf32>
    "tpu.trace_stop"() : () -> ()
    %92 = arith.truncf %91 : vector<4x32x32xf32> to vector<4x32x32xbf16>
    %c0_35 = arith.constant 0 : index
    %c0_36 = arith.constant 0 : index
    %c0_37 = arith.constant 0 : index
    %93 = vector.load %arg6[%c0_35, %c0_36, %c0_37] : memref<4x32x128xbf16, #tpu.memory_space<vmem>>, vector<4x32x128xbf16>
    "tpu.trace_start"() <{level = 10 : i32, message = "hqd,hdc->hqc"}> : () -> ()
    %cst_38 = arith.constant dense<0.000000e+00> : vector<4x32x128xf32>
    %94 = tpu.matmul %92, %93, %cst_38 {dimension_numbers = #tpu.dot_dimension_numbers<[2], [1], [1], [2], [0, 0, 0, 1, 1, 2], [0], [0]>} : vector<4x32x32xbf16>, vector<4x32x128xbf16>, vector<4x32x128xf32> -> vector<4x32x128xf32>
    "tpu.trace_stop"() : () -> ()
    %cst_39 = arith.constant dense<0.000000e+00> : vector<32x128xf32>
    %95 = vector.multi_reduction <add>, %94, %cst_39 [0] : vector<4x32x128xf32> to vector<32x128xf32>
    %c0_40 = arith.constant 0 : index
    %c0_41 = arith.constant 0 : index
    %96 = vector.load %arg7[%c0_40, %c0_41] : memref<1x128xf32, #tpu.memory_space<vmem>>, vector<1x128xf32>
    %97 = vector.broadcast %96 : vector<1x128xf32> to vector<32x128xf32>
    %98 = arith.addf %95, %97 : vector<32x128xf32>
    %99 = arith.addf %6, %98 : vector<32x128xf32>
    %c0_42 = arith.constant 0 : index
    %c0_43 = arith.constant 0 : index
    %100 = vector.load %arg10[%c0_42, %c0_43] : memref<1x128xf32, #tpu.memory_space<vmem>>, vector<1x128xf32>
    %c0_44 = arith.constant 0 : index
    %c0_45 = arith.constant 0 : index
    %101 = vector.load %arg11[%c0_44, %c0_45] : memref<1x128xf32, #tpu.memory_space<vmem>>, vector<1x128xf32>
    %cst_46 = arith.constant dense<0.000000e+00> : vector<32xf32>
    %102 = vector.multi_reduction <add>, %99, %cst_46 [1] : vector<32x128xf32> to vector<32xf32>
    %103 = vector.shape_cast %102 : vector<32xf32> to vector<32x1xf32>
    %cst_47 = arith.constant 1.280000e+02 : f32
    %104 = vector.broadcast %cst_47 : f32 to vector<32x1xf32>
    %105 = arith.divf %103, %104 : vector<32x1xf32>
    %106 = vector.broadcast %105 : vector<32x1xf32> to vector<32x128xf32>
    %107 = arith.subf %99, %106 : vector<32x128xf32>
    %108 = arith.mulf %107, %107 : vector<32x128xf32>
    %cst_48 = arith.constant dense<0.000000e+00> : vector<32xf32>
    %109 = vector.multi_reduction <add>, %108, %cst_48 [1] : vector<32x128xf32> to vector<32xf32>
    %110 = vector.shape_cast %109 : vector<32xf32> to vector<32x1xf32>
    %cst_49 = arith.constant 1.280000e+02 : f32
    %111 = vector.broadcast %cst_49 : f32 to vector<32x1xf32>
    %112 = arith.divf %110, %111 : vector<32x1xf32>
    %113 = vector.broadcast %105 : vector<32x1xf32> to vector<32x128xf32>
    %114 = arith.subf %99, %113 : vector<32x128xf32>
    %cst_50 = arith.constant 9.99999974E-6 : f32
    %115 = vector.broadcast %cst_50 : f32 to vector<32x1xf32>
    %116 = arith.addf %112, %115 : vector<32x1xf32>
    %117 = math.rsqrt %116 : vector<32x1xf32>
    %118 = vector.broadcast %117 : vector<32x1xf32> to vector<32x128xf32>
    %119 = arith.mulf %114, %118 : vector<32x128xf32>
    %120 = vector.broadcast %100 : vector<1x128xf32> to vector<32x128xf32>
    %121 = arith.mulf %119, %120 : vector<32x128xf32>
    %122 = vector.broadcast %101 : vector<1x128xf32> to vector<32x128xf32>
    %123 = arith.addf %121, %122 : vector<32x128xf32>
    %124 = arith.truncf %123 : vector<32x128xf32> to vector<32x128xbf16>
    %c0_51 = arith.constant 0 : index
    %c0_52 = arith.constant 0 : index
    %125 = vector.load %arg12[%c0_51, %c0_52] : memref<128x512xbf16, #tpu.memory_space<vmem>>, vector<128x512xbf16>
    %cst_53 = arith.constant dense<0.000000e+00> : vector<32x512xf32>
    %126 = tpu.matmul %124, %125, %cst_53 {dimension_numbers = #tpu.dot_dimension_numbers<[1], [0], [0], [1], [0, 0, 1, 1], [], []>} : vector<32x128xbf16>, vector<128x512xbf16>, vector<32x512xf32> -> vector<32x512xf32>
    %c0_54 = arith.constant 0 : index
    %c0_55 = arith.constant 0 : index
    %127 = vector.load %arg13[%c0_54, %c0_55] : memref<1x512xf32, #tpu.memory_space<vmem>>, vector<1x512xf32>
    %128 = vector.broadcast %127 : vector<1x512xf32> to vector<32x512xf32>
    %129 = arith.addf %126, %128 : vector<32x512xf32>
    %cst_56 = arith.constant 0.000000e+00 : f32
    %130 = vector.broadcast %cst_56 : f32 to vector<32x512xf32>
    %131 = arith.maximumf %129, %130 : vector<32x512xf32>
    %132 = arith.truncf %131 : vector<32x512xf32> to vector<32x512xbf16>
    %c0_57 = arith.constant 0 : index
    %c0_58 = arith.constant 0 : index
    %133 = vector.load %arg14[%c0_57, %c0_58] : memref<512x128xbf16, #tpu.memory_space<vmem>>, vector<512x128xbf16>
    %cst_59 = arith.constant dense<0.000000e+00> : vector<32x128xf32>
    %134 = tpu.matmul %132, %133, %cst_59 {dimension_numbers = #tpu.dot_dimension_numbers<[1], [0], [0], [1], [0, 0, 1, 1], [], []>} : vector<32x512xbf16>, vector<512x128xbf16>, vector<32x128xf32> -> vector<32x128xf32>
    %c0_60 = arith.constant 0 : index
    %c0_61 = arith.constant 0 : index
    %135 = vector.load %arg15[%c0_60, %c0_61] : memref<1x128xf32, #tpu.memory_space<vmem>>, vector<1x128xf32>
    %136 = vector.broadcast %135 : vector<1x128xf32> to vector<32x128xf32>
    %137 = arith.addf %134, %136 : vector<32x128xf32>
    %138 = arith.addf %99, %137 : vector<32x128xf32>
    %c0_62 = arith.constant 0 : index
    %c0_63 = arith.constant 0 : index
    %c0_64 = arith.constant 0 : index
    %139 = vector.load %arg16[%c0_62, %c0_63, %c0_64] : memref<1x32x128xf32, #tpu.memory_space<vmem>>, vector<1x32x128xf32>
    %140 = vector.shape_cast %139 : vector<1x32x128xf32> to vector<32x128xf32>
    %141 = vector.shape_cast %138 : vector<32x128xf32> to vector<1x32x128xf32>
    tpu.vector_store %arg16[%c0_62, %c0_63, %c0_64], %141 {strides = array<i32>} : memref<1x32x128xf32, #tpu.memory_space<vmem>>, vector<1x32x128xf32>,
    return
  }
  func.func @transform_0(%arg0: i32, %arg1: i32) -> (i32, i32, i32) {
    %c0_i32 = arith.constant 0 : i32
    %c0_i32_0 = arith.constant 0 : i32
    %c0_i32_1 = arith.constant 0 : i32
    return %arg0, %c0_i32, %c0_i32_0 : i32, i32, i32
  }
  func.func @transform_1(%arg0: i32, %arg1: i32) -> (i32, i32, i32) {
    %c0_i32 = arith.constant 0 : i32
    %c0_i32_0 = arith.constant 0 : i32
    %c0_i32_1 = arith.constant 0 : i32
    %c0_i32_2 = arith.constant 0 : i32
    return %c0_i32, %c0_i32_0, %c0_i32_1 : i32, i32, i32
  }
  func.func @transform_2(%arg0: i32, %arg1: i32) -> (i32, i32, i32) {
    %c0_i32 = arith.constant 0 : i32
    %c0_i32_0 = arith.constant 0 : i32
    %c0_i32_1 = arith.constant 0 : i32
    %c0_i32_2 = arith.constant 0 : i32
    return %c0_i32, %c0_i32_0, %c0_i32_1 : i32, i32, i32
  }
  func.func @transform_3(%arg0: i32, %arg1: i32) -> (i32, i32, i32) {
    %c0_i32 = arith.constant 0 : i32
    %c0_i32_0 = arith.constant 0 : i32
    %c0_i32_1 = arith.constant 0 : i32
    %c0_i32_2 = arith.constant 0 : i32
    return %c0_i32, %c0_i32_0, %c0_i32_1 : i32, i32, i32
  }
  func.func @transform_4(%arg0: i32, %arg1: i32) -> (i32, i32, i32) {
    %c0_i32 = arith.constant 0 : i32
    %c0_i32_0 = arith.constant 0 : i32
    %c0_i32_1 = arith.constant 0 : i32
    %c0_i32_2 = arith.constant 0 : i32
    return %c0_i32, %c0_i32_0, %c0_i32_1 : i32, i32, i32
  }
  func.func @transform_5(%arg0: i32, %arg1: i32) -> (i32, i32) {
    %c0_i32 = arith.constant 0 : i32
    %c0_i32_0 = arith.constant 0 : i32
    %c0_i32_1 = arith.constant 0 : i32
    return %c0_i32, %c0_i32_0 : i32, i32
  }
  func.func @transform_6(%arg0: i32, %arg1: i32) -> (i32, i32) {
    %c0_i32 = arith.constant 0 : i32
    %c0_i32_0 = arith.constant 0 : i32
    %c0_i32_1 = arith.constant 0 : i32
    return %c0_i32, %c0_i32_0 : i32, i32
  }
  func.func @transform_7(%arg0: i32, %arg1: i32) -> (i32, i32) {
    %c0_i32 = arith.constant 0 : i32
    %c0_i32_0 = arith.constant 0 : i32
    %c0_i32_1 = arith.constant 0 : i32
    return %c0_i32, %c0_i32_0 : i32, i32
  }
  func.func @transform_8(%arg0: i32, %arg1: i32) -> (i32, i32) {
    %c0_i32 = arith.constant 0 : i32
    %c0_i32_0 = arith.constant 0 : i32
    %c0_i32_1 = arith.constant 0 : i32
    return %c0_i32, %c0_i32_0 : i32, i32
  }
  func.func @transform_9(%arg0: i32, %arg1: i32) -> (i32, i32) {
    %c0_i32 = arith.constant 0 : i32
    %c0_i32_0 = arith.constant 0 : i32
    %c0_i32_1 = arith.constant 0 : i32
    return %c0_i32, %c0_i32_0 : i32, i32
  }
  func.func @transform_10(%arg0: i32, %arg1: i32) -> (i32, i32) {
    %c0_i32 = arith.constant 0 : i32
    %c0_i32_0 = arith.constant 0 : i32
    %c0_i32_1 = arith.constant 0 : i32
    return %c0_i32, %c0_i32_0 : i32, i32
  }
  func.func @transform_11(%arg0: i32, %arg1: i32) -> (i32, i32) {
    %c0_i32 = arith.constant 0 : i32
    %c0_i32_0 = arith.constant 0 : i32
    %c0_i32_1 = arith.constant 0 : i32
    return %c0_i32, %c0_i32_0 : i32, i32
  }
  func.func @transform_12(%arg0: i32, %arg1: i32) -> (i32, i32) {
    %c0_i32 = arith.constant 0 : i32
    %c0_i32_0 = arith.constant 0 : i32
    %c0_i32_1 = arith.constant 0 : i32
    return %c0_i32, %c0_i32_0 : i32, i32
  }
  func.func @transform_13(%arg0: i32, %arg1: i32) -> (i32, i32) {
    %c0_i32 = arith.constant 0 : i32
    %c0_i32_0 = arith.constant 0 : i32
    %c0_i32_1 = arith.constant 0 : i32
    return %c0_i32, %c0_i32_0 : i32, i32
  }
  func.func @transform_14(%arg0: i32, %arg1: i32) -> (i32, i32, i32) {
    %c0_i32 = arith.constant 0 : i32
    %c0_i32_0 = arith.constant 0 : i32
    return %arg0, %arg1, %c0_i32 : i32, i32, i32
  }
}

</mosaic_0001>

<bundles_post_ra>
// kernel: tpu_custom_call.1
= control target key start
LH: loop header
LB: loop body
LE: loop exit
PB: predicated region body
PF: predicated region fallthrough
CT: control target
= control target key end

     0   :  { %s6757_s0 = inlined_call_operand.vmem [shape: f32[2,64,128], index: 0, kind: input, shape index: {}]   ;;  %s6758_s1 = inlined_call_operand.vmem [shape: bf16[4,128,32], index: 1, kind: input, shape index: {}]   ;;  %s6759_s2 = inlined_call_operand.vmem [shape: bf16[4,128,32], index: 2, kind: input, shape index: {}]   ;;  %s6760_s3 = inlined_call_operand.vmem [shape: bf16[4,128,32], index: 3, kind: input, shape index: {}]   ;;  %s6761_s4 = inlined_call_operand.vmem [shape: bf16[4,32,128], index: 4, kind: input, shape index: {}]   ;;  %s6762_s5 = inlined_call_operand.vmem [shape: f32[1,128], index: 5, kind: input, shape index: {}]   ;;  %s6763_s6 = inlined_call_operand.vmem [shape: f32[1,128], index: 6, kind: input, shape index: {}]   ;;  %s6764_s7 = inlined_call_operand.vmem [shape: f32[1,128], index: 7, kind: input, shape index: {}]   ;;  %s6765_s8 = inlined_call_operand.vmem [shape: f32[1,128], index: 8, kind: input, shape index: {}]   ;;  %s6766_s9 = inlined_call_operand.vmem [shape: f32[1,128], index: 9, kind: input, shape index: {}]   ;;  %s6767_s10 = inlined_call_operand.vmem [shape: bf16[128,512], index: 10, kind: input, shape index: {}]   ;;  %s6768_s11 = inlined_call_operand.vmem [shape: f32[1,512], index: 11, kind: input, shape index: {}]   ;;  %s6769_s12 = inlined_call_operand.vmem [shape: bf16[512,128], index: 12, kind: input, shape index: {}]   ;;  %s6770_s13 = inlined_call_operand.vmem [shape: f32[1,128], index: 13, kind: input, shape index: {}]   ;;  %s6771_s14 = inlined_call_operand.hbm [shape: f32[2,64,128], index: 14, kind: output, shape index: {}]  }
   0x1   :  { %6780 = sst [smem:[#allocation11_spill]] %s6757_s0 }
   0x2   :  { %6781 = sst [smem:[#allocation12_spill]] %s6770_s13 }
   0x3   :  { %6782 = sst [smem:[#allocation13_spill]] %s6771_s14 }
   0x4   :  { %19 = vsyncpa [#allocation3], 0 }
   0x5   :  { %21 = vsyncpa [#allocation3 + $0x1], 0  ;;  %s5530_s29 = smov 0   ;;  %s5532_s30 = smov 0  }
   0x6   :  { %s5534_s15 = smov 0   ;;  %s5536_s16 = smov 0  }
   0x7   :  { %s5538_s17 = smov 0   ;;  %s5540_s18 = smov 0  }
   0x8   :  { %s5542_s19 = smov 0   ;;  %s5544_s20 = smov 0  }
   0x9 LB: > { %6783 = sst [smem:[#allocation5_spill]] %s5421_s29  ;;  %s4113_s21 = sadd.s32 4294967295, %s5449_s20   ;;  %s5449_s20 = sphi %s5544_s20, %s27_s20   ;;  %s5445_s19 = sphi %s5542_s19, %s6804_s19   ;;  %s5441_s18 = sphi %s5540_s18, %s6798_s18   ;;  %s5437_s17 = sphi %s5538_s17, %s6803_s17   ;;  %s5433_s16 = sphi %s5536_s16, %s6797_s16   ;;  %s5429_s15 = sphi %s5534_s15, %s6802_s15   ;;  %s5425_s30 = sphi %s5532_s30, %s6801_s30   ;;  %s5421_s29 = sphi %s5530_s29, %s6800_s29  }
   0xa   : > { %6784 = sst [smem:[#allocation6_spill]] %s5441_s18  ;;  %s4114_s22 = sadd.s32 4294967294, %s5449_s20  }
   0xb   : > { %s36_s23 = sadd.s32 1, %s5441_s18  ;;  %s39_s24 = sadd.s32 1, %s5445_s19 }
   0xc   : > { %p37_p0 = scmp.ge.s32.totalorder %s36_s23, 2  ;;  %p357_p1 = scmp.ne.s32.totalorder %s5429_s15, %s5425_s30 }
   0xd   : > { %p358_p2 = scmp.eq.s32.totalorder %s4113_s21, 3  ;;  %p363_p5 = scmp.ne.s32.totalorder %s5425_s30, %s5421_s29 }
   0xe   : > { %s6806_s23 = smov (%p37_p0, %s36_s23), 0  ;;  %s6808_s24 = smov (!%p37_p0, %s39_s24), %s5445_s19 }
   0xf   : > { %6785 = sst [smem:[#allocation7_spill]] %s6806_s23  ;;  %s343_s25 = ssub.s32 %s5441_s18, %s6806_s23 }
  0x10   : > { %p5581_p3 = por %p358_p2, %p357_p1  ;;  %p41_p4 = scmp.ge.s32.totalorder %s6808_s24, 2 }
  0x11   : > { %p364_p6 = scmp.eq.s32.totalorder %s4114_s22, 3  ;;  %p4117_p7 = scmp.ge.s32.totalorder %s5449_s20, 1 }
  0x12   : > { %s6786_s26 = scalar_select %p5581_p3, 1, 0 }
  0x13   : > { %s6810_s24 = smov (%p41_p4, %s6808_s24), 0  ;;  %p5590_p8 = por %p364_p6, %p363_p5 }
  0x14   : > { %6787 = sst [smem:[#allocation8_spill]] %s6786_s26  ;;  %p429_p9 = scmp.lt.s32.totalorder %s5449_s20, 5 }
  0x15   : > { %6788 = sst [smem:[#allocation9_spill]] %s6810_s24  ;;  %s342_s28 = ssub.s32 %s5445_s19, %s6810_s24 }
  0x16   : > { %s6789_s27 = scalar_select %p5590_p8, 1, 0 }
  0x17   : > { %s347_s21 = sadd.s32 1, %s5429_s15  ;;  %s344_s14 = sor.u32 %s343_s25, %s342_s28 }
  0x18   : > { %6790 = sst [smem:[#allocation10_spill]] %s6789_s27  ;;  %p430_p10 = pnand %p4117_p7, %p429_p9 }
  0x19   : > { %p345_p11 = scmp.eq.s32.totalorder %s344_s14, 0  ;;  %p475_p12 = scmp.lt.s32.totalorder (!%p430_p10), %s5437_s17, 1 }
  0x1a   : > { %433 = sbr.rel (%p430_p10) target bundleno = 2364 (0x93c), region = 76  ;;  %s4121_s22 = sshll.u32 (!%p430_p10), %s5433_s16, 5 }
  0x1b   : > { %s5599_s23 = scalar_select %p345_p11, %s5429_s15, %s347_s21  }
  0x1c   : > { %s6791_s0 = sld [smem:[#allocation11_spill]] (!%p430_p10)  ;;  %s472_s13 = sand.u32 (!%p430_p10), 1, %s5425_s30  }
  0x1d   : > { %s6792_s21 = sld [smem:[#allocation12_spill]] (!%p430_p10)  ;;  %s4118_s14 = sshll.u32 (!%p430_p10), %s472_s13, 5 }
  0x1e   : > { %s6794_s28 = sld [smem:[#allocation13_spill]] (!%p430_p10) }
  0x1f   : > { %s476_s18 = scalar_select %p475_p12, %s5437_s17, 1  ;;  %v5073_v44 = vld [vmem:[%s6758_s1 + $0x38] sm:$0xff]   ;;  %v5075_v57 = vld [vmem:[%s6758_s1 + $0x30] sm:$0xff]   ;;  %v5077_v63 = vld [vmem:[%s6758_s1 + $0x28] sm:$0xff]   ;;  %vm2197_vm0 = vcmask 261120   ;;  %vm2498_vm2 = vcmask 523264  }
  0x20   : > { %v5074_v45 = vld [vmem:[%s6758_s1 + $0x78] sm:$0xff]   ;;  %4583 = vmatprep.subr.bf16.mxu0 %v5073_v44  ;;  %v5076_v58 = vld [vmem:[%s6758_s1 + $0x70] sm:$0xff]  }
  0x21   : > { %s4326_s29 = sshll.u32 %s476_s18, 6  ;;  %4603 = vmatprep.subr.bf16.mxu1 %v5074_v45  ;;  %4584 = vmatpush3.bf16.msra.mxu0 %v5073_v44  ;;  %v5734_v44 = vld [vmem:[%s6763_s6] ss:$0 sm:$0xff]  ;;  %s4322_s18 = sshll.u32 %s5437_s17, 3 }
  0x22   : > { %s479_s27 = scalar_lea.vmem %s6791_s0, %s4326_s29  ;;  %4604 = vmatpush3.bf16.msra.mxu1 %v5074_v45  ;;  %4585 = vmatprep.subr.bf16.mxu0 %v5075_v57  ;;  %s474_s29 = scalar_lea.vmem [#allocation2], %s4118_s14 }
  0x23   : > { %s5609_s24 = scalar_lea.vmem %s479_s27, %s4121_s22  ;;  %v482_v4 = vld [vmem:[%s479_s27] sm:$0xff]  ;;  %v483_v5 = vld [vmem:[%s479_s27 + $0x8] sm:$0xff]  ;;  %v484_v6 = vld [vmem:[%s479_s27 + $0x10] sm:$0xff]  ;;  %4605 = vmatprep.subr.bf16.mxu1 %v5076_v58  ;;  %s6706_s14 = scalar_lea.sflag [#allocation3], %s472_s13 }
  0x24   : > { %v492_v0 = vld [vmem:[%s5609_s24] sm:$0xff]  ;;  %v494_v1 = vld [vmem:[%s5609_s24 + $0x10] sm:$0xff]  ;;  %v493_v2 = vld [vmem:[%s5609_s24 + $0x8] sm:$0xff] }
  0x25   : > { %615 = vadd.xlane.f32.xlu0 %v492_v0  ;;  %619 = vadd.xlane.f32.xlu1 %v494_v1  ;;  %v495_v3 = vld [vmem:[%s5609_s24 + $0x18] sm:$0xff]  ;;  %v486_v8 = vld [vmem:[%s479_s27 + $0x20] sm:$0xff]  ;;  %v487_v9 = vld [vmem:[%s479_s27 + $0x28] sm:$0xff] }
  0x26   : > { %v485_v7 = vld [vmem:[%s479_s27 + $0x18] sm:$0xff]  ;;  %v5615_v10 = vld [vmem:[%s479_s27 + $0x30] sm:$0xff]  ;;  %4586 = vmatpush3.bf16.msra.mxu0 %v5075_v57  ;;  %4606 = vmatpush3.bf16.msra.mxu1 %v5076_v58  ;;  %v5741_v57 = vld [vmem:[%s6764_s7] ss:$0 sm:$0xff] }
  0x27   : > { %v5617_v11 = vld [vmem:[%s479_s27 + $0x38] sm:$0xff]  ;;  %4587 = vmatprep.subr.bf16.mxu0 %v5077_v63  ;;  %s4035_s27 = sshll.u32 %s474_s29, 4  ;;  %s6696_s27 = int_to_ptr.vmem [resolvable:$true] %s4035_s27 }
  0x29   : > { %617 = vadd.xlane.f32.xlu0 %v493_v2  ;;  %621 = vadd.xlane.f32.xlu1 %v495_v3 }
  0x2a   : > { %4588 = vmatpush3.bf16.msra.mxu0 %v5077_v63 }
  0x2d   : > { %498 = vadd.xlane.f32.xlu0 %v482_v4  ;;  %500 = vadd.xlane.f32.xlu1 %v483_v5 }
  0x31   : > { %502 = vadd.xlane.f32.xlu0 %v484_v6  ;;  %504 = vadd.xlane.f32.xlu1 %v485_v7 }
  0x35   : > { %506 = vadd.xlane.f32.xlu0 %v486_v8  ;;  %508 = vadd.xlane.f32.xlu1 %v487_v9 }
  0x39   : > { %510 = vadd.xlane.f32.xlu0 %v5615_v10  ;;  %512 = vadd.xlane.f32.xlu1 %v5617_v11 }
  0xae   : > { %v616_v12 = vpop.xlane.xlu0 %615  ;;  %v620_v13 = vpop.xlane.xlu1 %619 }
  0xaf   : > { %v623_v14 = vmul.f32 0.0078125, %v616_v12  ;;  %v625_v15 = vmul.f32 0.0078125, %v620_v13  ;;  %v5722_v12 = vld [vmem:[%s6758_s1 + $0xb8] sm:$0xff]  }
  0xb0   : > { %v5727_v13 = vld [vmem:[%s6758_s1 + $0xf8] sm:$0xff]  }
  0xb1   : > { %v5621_v16 = vsub.f32 %v492_v0, %v623_v14  ;;  %v5623_v17 = vsub.f32 %v494_v1, %v625_v15  ;;  %v5078_v0 = vld [vmem:[%s6758_s1 + $0x68] sm:$0xff]  }
  0xb2   : > { %v618_v18 = vpop.xlane.xlu0 %617  ;;  %v622_v19 = vpop.xlane.xlu1 %621  ;;  %4607 = vmatprep.subr.bf16.mxu1 %v5078_v0 }
  0xb3   : > { %v624_v20 = vmul.f32 0.0078125, %v618_v18  ;;  %v631_v21 = vmul.f32 %v5621_v16, %v5621_v16  ;;  %v626_v22 = vmul.f32 0.0078125, %v622_v19  ;;  %v633_v25 = vmul.f32 %v5623_v17, %v5623_v17  ;;  %4608 = vmatpush3.bf16.msra.mxu1 %v5078_v0 }
  0xb5   : > { %v5627_v23 = vsub.f32 %v493_v2, %v624_v20  ;;  %635 = vadd.xlane.f32.xlu0 %v631_v21  ;;  %v5629_v24 = vsub.f32 %v495_v3, %v626_v22  ;;  %v5079_v2 = vld [vmem:[%s6758_s1 + $0x20] sm:$0xff]  }
  0xb6   : > { %v499_v26 = vpop.xlane.xlu0 %498  ;;  %v501_v27 = vpop.xlane.xlu1 %500  ;;  %v5080_v3 = vld [vmem:[%s6758_s1 + $0x60] sm:$0xff]   ;;  %4589 = vmatprep.subr.bf16.mxu0 %v5079_v2 }
  0xb7   : > { %v515_v28 = vmul.f32 0.0078125, %v499_v26  ;;  %v632_v29 = vmul.f32 %v5627_v23, %v5627_v23  ;;  %v516_v30 = vmul.f32 0.0078125, %v501_v27  ;;  %v634_v33 = vmul.f32 %v5629_v24, %v5629_v24  ;;  %4609 = vmatprep.subr.bf16.mxu1 %v5080_v3  ;;  %4590 = vmatpush3.bf16.msra.mxu0 %v5079_v2 }
  0xb8   : > { %4610 = vmatpush3.bf16.msra.mxu1 %v5080_v3 }
  0xb9   : > { %v5635_v31 = vsub.f32 %v482_v4, %v515_v28  ;;  %637 = vadd.xlane.f32.xlu1 %v632_v29  ;;  %639 = vadd.xlane.f32.xlu0 %v633_v25  ;;  %v5637_v32 = vsub.f32 %v483_v5, %v516_v30  ;;  %v5081_v4 = vld [vmem:[%s6758_s1 + $0x18] sm:$0xff]  }
  0xba   : > { %v503_v34 = vpop.xlane.xlu0 %502  ;;  %v505_v35 = vpop.xlane.xlu1 %504  ;;  %v5082_v5 = vld [vmem:[%s6758_s1 + $0x58] sm:$0xff]   ;;  %4591 = vmatprep.subr.bf16.mxu0 %v5081_v4 }
  0xbb   : > { %v517_v36 = vmul.f32 0.0078125, %v503_v34  ;;  %v531_v37 = vmul.f32 %v5635_v31, %v5635_v31  ;;  %v518_v38 = vmul.f32 0.0078125, %v505_v35  ;;  %v532_v41 = vmul.f32 %v5637_v32, %v5637_v32  ;;  %4611 = vmatprep.subr.bf16.mxu1 %v5082_v5  ;;  %4592 = vmatpush3.bf16.msra.mxu0 %v5081_v4 }
  0xbc   : > { %4612 = vmatpush3.bf16.msra.mxu1 %v5082_v5 }
  0xbd   : > { %v5643_v39 = vsub.f32 %v484_v6, %v517_v36  ;;  %641 = vadd.xlane.f32.xlu1 %v634_v33  ;;  %539 = vadd.xlane.f32.xlu0 %v531_v37  ;;  %v5645_v40 = vsub.f32 %v485_v7, %v518_v38  ;;  %v5083_v6 = vld [vmem:[%s6758_s1 + $0x10] sm:$0xff]  }
  0xbe   : > { %v507_v42 = vpop.xlane.xlu0 %506  ;;  %v509_v43 = vpop.xlane.xlu1 %508  ;;  %v5084_v7 = vld [vmem:[%s6758_s1 + $0x50] sm:$0xff]   ;;  %4593 = vmatprep.subr.bf16.mxu0 %v5083_v6 }
  0xbf   : > { %v519_v46 = vmul.f32 0.0078125, %v507_v42  ;;  %v533_v47 = vmul.f32 %v5643_v39, %v5643_v39  ;;  %v520_v48 = vmul.f32 0.0078125, %v509_v43  ;;  %v534_v51 = vmul.f32 %v5645_v40, %v5645_v40  ;;  %4613 = vmatprep.subr.bf16.mxu1 %v5084_v7  ;;  %4594 = vmatpush3.bf16.msra.mxu0 %v5083_v6 }
  0xc0   : > { %4614 = vmatpush3.bf16.msra.mxu1 %v5084_v7 }
  0xc1   : > { %v5657_v49 = vsub.f32 %v486_v8, %v519_v46  ;;  %541 = vadd.xlane.f32.xlu1 %v532_v41  ;;  %543 = vadd.xlane.f32.xlu0 %v533_v47  ;;  %v5659_v50 = vsub.f32 %v487_v9, %v520_v48  ;;  %v5085_v8 = vld [vmem:[%s6758_s1 + $0x8] sm:$0xff]  }
  0xc2   : > { %v511_v52 = vpop.xlane.xlu0 %510  ;;  %v513_v53 = vpop.xlane.xlu1 %512  ;;  %v5086_v9 = vld [vmem:[%s6758_s1 + $0x48] sm:$0xff]   ;;  %4595 = vmatprep.subr.bf16.mxu0 %v5085_v8 }
  0xc3   : > { %v521_v54 = vmul.f32 0.0078125, %v511_v52  ;;  %v535_v55 = vmul.f32 %v5657_v49, %v5657_v49  ;;  %v522_v56 = vmul.f32 0.0078125, %v513_v53  ;;  %v536_v61 = vmul.f32 %v5659_v50, %v5659_v50  ;;  %4615 = vmatprep.subr.bf16.mxu1 %v5086_v9  ;;  %4596 = vmatpush3.bf16.msra.mxu0 %v5085_v8 }
  0xc4   : > { %4616 = vmatpush3.bf16.msra.mxu1 %v5086_v9 }
  0xc5   : > { %v5672_v59 = vsub.f32 %v5615_v10, %v521_v54  ;;  %545 = vadd.xlane.f32.xlu1 %v534_v51  ;;  %547 = vadd.xlane.f32.xlu0 %v535_v55  ;;  %v5675_v60 = vsub.f32 %v5617_v11, %v522_v56  ;;  %v5087_v10 = vld [vmem:[%s6758_s1] sm:$0xff]  }
  0xc6   : > { %v5088_v11 = vld [vmem:[%s6758_s1 + $0x40] sm:$0xff]   ;;  %4597 = vmatprep.subr.bf16.mxu0 %v5087_v10 }
  0xc7   : > { %v537_v62 = vmul.f32 %v5672_v59, %v5672_v59  ;;  %v538_v1 = vmul.f32 %v5675_v60, %v5675_v60  ;;  %4617 = vmatprep.subr.bf16.mxu1 %v5088_v11  ;;  %4598 = vmatpush3.bf16.msra.mxu0 %v5087_v10 }
  0xc8   : > { %4618 = vmatpush3.bf16.msra.mxu1 %v5088_v11  ;;  %4623 = vmatprep.subr.bf16.mxu0 %v5722_v12 }
  0xc9   : > { %549 = vadd.xlane.f32.xlu1 %v536_v61  ;;  %551 = vadd.xlane.f32.xlu0 %v537_v62 }
  0xca   : > { %4643 = vmatprep.subr.bf16.mxu1 %v5727_v13 }
  0xcd   : > { %553 = vadd.xlane.f32.xlu1 %v538_v1 }
 0x13e   : > { %v636_v14 = vpop.xlane.xlu0 %635 }
 0x13f   : > { %v643_v15 = vmul.f32 0.0078125, %v636_v14 }
 0x141   : > { %v647_v18 = vadd.f32 1e-05, %v643_v15 }
 0x142   : > { %v638_v19 = vpop.xlane.xlu1 %637  ;;  %v640_v20 = vpop.xlane.xlu0 %639 }
 0x143   : > { %5257 = vrsqrt.f32 %v647_v18  ;;  %v644_v21 = vmul.f32 0.0078125, %v638_v19  ;;  %v645_v22 = vmul.f32 0.0078125, %v640_v20 }
 0x145   : > { %v648_v25 = vadd.f32 1e-05, %v644_v21  ;;  %v649_v26 = vadd.f32 1e-05, %v645_v22  ;;  %v5091_v21 = vld [vmem:[%s6758_s1 + $0xb0] sm:$0xff]  }
 0x146   : > { %v642_v27 = vpop.xlane.xlu1 %641  ;;  %v540_v28 = vpop.xlane.xlu0 %539  ;;  %v5092_v22 = vld [vmem:[%s6758_s1 + $0xf0] sm:$0xff]  }
 0x147   : > { %5259 = vrsqrt.f32 %v648_v25  ;;  %v646_v29 = vmul.f32 0.0078125, %v642_v27  ;;  %v555_v14 = vmul.f32 0.0078125, %v540_v28 }
 0x148   : > { %5261 = vrsqrt.f32 %v649_v26 }
 0x149   : > { %v650_v30 = vadd.f32 1e-05, %v646_v29 }
 0x14a   : > { %v542_v33 = vpop.xlane.xlu1 %541  ;;  %v544_v34 = vpop.xlane.xlu0 %543 }
 0x14b   : > { %5263 = vrsqrt.f32 %v650_v30  ;;  %v557_v35 = vmul.f32 0.0078125, %v544_v34  ;;  %v5094_v30 = vld [vmem:[%s6758_s1 + $0xe8] sm:$0xff]  }
 0x14d   : > { %v565_v36 = vadd.f32 1e-05, %v557_v35 }
 0x14e   : > { %v546_v37 = vpop.xlane.xlu1 %545  ;;  %v548_v38 = vpop.xlane.xlu0 %547 }
 0x14f   : > { %v558_v41 = vmul.f32 0.0078125, %v546_v37  ;;  %v559_v42 = vmul.f32 0.0078125, %v548_v38  ;;  %5265 = vrsqrt.f32 %v565_v36 }
 0x150   : > { %v5258_v43 = vpop.eup %5257 }
 0x151   : > { %v566_v45 = vadd.f32 1e-05, %v558_v41  ;;  %v567_v46 = vadd.f32 1e-05, %v559_v42  ;;  %v655_v47 = vmul.f32 %v5258_v43, %v5621_v16  ;;  %v5095_v41 = vld [vmem:[%s6758_s1 + $0xa0] sm:$0xff]  }
 0x152   : > { %v550_v48 = vpop.xlane.xlu1 %549  ;;  %v552_v51 = vpop.xlane.xlu0 %551 }
 0x153   : > { %5267 = vrsqrt.f32 %v566_v45  ;;  %v560_v52 = vmul.f32 0.0078125, %v550_v48  ;;  %v561_v53 = vmul.f32 0.0078125, %v552_v51  ;;  %v659_v55 = vmul.f32 %v5734_v44, %v655_v47  ;;  %v5097_v51 = vld [vmem:[%s6758_s1 + $0x98] sm:$0xff]  }
 0x154   : > { %v5260_v54 = vpop.eup %5259  ;;  %5269 = vrsqrt.f32 %v567_v46 }
 0x155   : > { %v5262_v56 = vpop.eup %5261  ;;  %v568_v58 = vadd.f32 1e-05, %v560_v52  ;;  %v569_v61 = vadd.f32 1e-05, %v561_v53  ;;  %v656_v62 = vmul.f32 %v5260_v54, %v5627_v23  ;;  %v663_v3 = vadd.f32 %v5741_v57, %v659_v55  ;;  %v5098_v52 = vld [vmem:[%s6758_s1 + $0xd8] sm:$0xff]   ;;  %v5099_v54 = vld [vmem:[%s6758_s1 + $0x90] sm:$0xff]  }
 0x156   : > { %v554_v16 = vpop.xlane.xlu1 %553  ;;  %v657_v63 = vmul.f32 %v5262_v56, %v5623_v17  ;;  %v556_v17 = vmul.f32 0.0078125, %v542_v33  ;;  %v5100_v55 = vld [vmem:[%s6758_s1 + $0xd0] sm:$0xff]  }
 0x157   : > { %5271 = vrsqrt.f32 %v568_v58  ;;  %v562_v0 = vmul.f32 0.0078125, %v554_v16  ;;  %v660_v1 = vmul.f32 %v5734_v44, %v656_v62  ;;  %v5102_v62 = vld [vmem:[%s6758_s1 + $0xc8] sm:$0xff]  }
 0x158   : > { %v5264_v2 = vpop.eup %5263  ;;  %5273 = vrsqrt.f32 %v569_v61  ;;  %v661_v7 = vmul.f32 %v5734_v44, %v657_v63  ;;  %v564_v19 = vadd.f32 1e-05, %v556_v17  ;;  %v5101_v61 = vld [vmem:[%s6758_s1 + $0x88] sm:$0xff]   ;;  %v5112_v17 = vld [vmem:[%s6759_s2 + $0x60] sm:$0xff]  }
 0x159   : > { %v570_v4 = vadd.f32 1e-05, %v562_v0  ;;  %v664_v5 = vadd.f32 %v5741_v57, %v660_v1  ;;  %v658_v6 = vmul.f32 %v5264_v2, %v5629_v24  ;;  %v5103_v0 = vld [vmem:[%s6758_s1 + $0x80] sm:$0xff]  }
 0x15a   : > { %v665_v10 = vadd.f32 %v5741_v57, %v661_v7  ;;  %v5104_v1 = vld [vmem:[%s6758_s1 + $0xc0] sm:$0xff]   ;;  %v5108_v7 = vld [vmem:[%s6759_s2 + $0x70] sm:$0xff]  }
 0x15b   : > { %5275 = vrsqrt.f32 %v570_v4  ;;  %v667_v23 = vpack.c.bf16 %v664_v5, %v663_v3  ;;  %v662_v8 = vmul.f32 %v5734_v44, %v658_v6  ;;  %v5107_v6 = vld [vmem:[%s6759_s2 + $0x30] sm:$0xff]  }
 0x15c   : > { %v5266_v9 = vpop.eup %5265  ;;  %5277 = vrsqrt.f32 %v564_v19  ;;  %v5120_v19 = vld [vmem:[%s6759_s2 + $0x40] sm:$0xff]  }
 0x15d   : > { %4599 = vmatprep.mubr.bf16.mxu0 %v667_v23  ;;  %4619 = vmatprep.mubr.bf16.mxu1 %v667_v23  ;;  %v666_v11 = vadd.f32 %v5741_v57, %v662_v8  ;;  %v581_v15 = vmul.f32 %v5266_v9, %v5643_v39  ;;  %v563_v39 = vadd.f32 1e-05, %v555_v14  ;;  %v5111_v8 = vld [vmem:[%s6759_s2 + $0x20] sm:$0xff]   ;;  %v5113_v9 = vld [vmem:[%s6759_s2 + $0x18] sm:$0xff]   ;;  %v5116_v14 = vld [vmem:[%s6759_s2 + $0x50] sm:$0xff]  }
 0x15f   : > { %v5754_v18 = vpack.c.bf16 %v666_v11, %v665_v10  ;;  %v595_v20 = vmul.f32 %v5734_v44, %v581_v15  ;;  %5279 = vrsqrt.f32 %v563_v39  ;;  %v5114_v10 = vld [vmem:[%s6759_s2 + $0x58] sm:$0xff]   ;;  %v5115_v11 = vld [vmem:[%s6759_s2 + $0x10] sm:$0xff]   ;;  %v5117_v15 = vld [vmem:[%s6759_s2 + $0x8] sm:$0xff]  }
 0x160   : > { %v5268_v24 = vpop.eup %5267  ;;  %v5126_v39 = vld [vmem:[%s6759_s2 + $0xe8] sm:$0xff]  }
 0x161   : > { %v5270_v25 = vpop.eup %5269  ;;  %v582_v26 = vmul.f32 %v5268_v24, %v5645_v40  ;;  %4600 = vmatmul.mubr.bf16.vlgmr.msra.gmra.mxu0 %v5754_v18  ;;  %4620 = vmatmul.mubr.bf16.vlgmr.msra.gmra.mxu1 %v5754_v18  ;;  %v609_v27 = vadd.f32 %v5741_v57, %v595_v20  ;;  %v5093_v40 = vld [vmem:[%s6758_s1 + $0xa8] sm:$0xff]   ;;  %v5119_v24 = vld [vmem:[%s6759_s2] sm:$0xff]   ;;  %v5121_v20 = vld [vmem:[%s6759_s2 + $0xb8] sm:$0xff]  }
 0x162   : > { %v583_v28 = vmul.f32 %v5270_v25, %v5657_v49  ;;  %4624 = vmatpush3.bf16.msra.mxu0 %v5722_v12  ;;  %4644 = vmatpush3.bf16.msra.mxu1 %v5727_v13  ;;  %v5124_v25 = vld [vmem:[%s6759_s2 + $0xf0] sm:$0xff]  }
 0x163   : > { %v596_v29 = vmul.f32 %v5734_v44, %v582_v26  ;;  %4639 = vmatprep.mubr.bf16.mxu0 %v667_v23  ;;  %4659 = vmatprep.mubr.bf16.mxu1 %v667_v23  ;;  %v5110_v23 = vld [vmem:[%s6759_s2 + $0x68] sm:$0xff]  }
 0x164   : > { %v5272_v33 = vpop.eup %5271  ;;  %v597_v49 = vmul.f32 %v5734_v44, %v583_v28  ;;  %4625 = vmatprep.subr.bf16.mxu0 %v5091_v21  ;;  %4645 = vmatprep.subr.bf16.mxu1 %v5092_v22  ;;  %v5125_v26 = vld [vmem:[%s6759_s2 + $0xa8] sm:$0xff]   ;;  %v5128_v28 = vld [vmem:[%s6759_s2 + $0xe0] sm:$0xff]  }
 0x165   : > { %v5274_v12 = vpop.eup %5273  ;;  %v610_v13 = vadd.f32 %v5741_v57, %v596_v29  ;;  %v584_v34 = vmul.f32 %v5272_v33, %v5659_v50  ;;  %v5096_v50 = vld [vmem:[%s6758_s1 + $0xe0] sm:$0xff]   ;;  %v5129_v29 = vld [vmem:[%s6759_s2 + $0x98] sm:$0xff]   ;;  %v5132_v33 = vld [vmem:[%s6759_s2 + $0xd0] sm:$0xff]  }
 0x166   : > { %v611_v35 = vadd.f32 %v5741_v57, %v597_v49  ;;  %v585_v36 = vmul.f32 %v5274_v12, %v5672_v59  ;;  %4626 = vmatpush3.bf16.msra.mxu0 %v5091_v21  ;;  %4646 = vmatpush3.bf16.msra.mxu1 %v5092_v22  ;;  %v5122_v21 = vld [vmem:[%s6759_s2 + $0xf8] sm:$0xff]   ;;  %v5123_v22 = vld [vmem:[%s6759_s2 + $0xb0] sm:$0xff]   ;;  %v5133_v49 = vld [vmem:[%s6759_s2 + $0x88] sm:$0xff]  }
 0x167   : > { %v5782_v37 = vpack.c.bf16 %v610_v13, %v609_v27  ;;  %v598_v38 = vmul.f32 %v5734_v44, %v584_v34  ;;  %4627 = vmatprep.subr.bf16.mxu0 %v5093_v40  ;;  %4647 = vmatprep.subr.bf16.mxu1 %v5094_v30  ;;  %v5127_v27 = vld [vmem:[%s6759_s2 + $0xa0] sm:$0xff]   ;;  %v5134_v12 = vld [vmem:[%s6759_s2 + $0xc8] sm:$0xff]  }
 0x168   : > { %v5276_v42 = vpop.eup %5275  ;;  %v599_v43 = vmul.f32 %v5734_v44, %v585_v36  ;;  %v5135_v13 = vld [vmem:[%s6759_s2 + $0x80] sm:$0xff]   ;;  %v5138_v36 = vld [vmem:[%s6760_s3 + $0x78] sm:$0xff]  }
 0x169   : > { %v612_v59 = vadd.f32 %v5741_v57, %v598_v38  ;;  %v586_v45 = vmul.f32 %v5276_v42, %v5675_v60  ;;  %v5278_v56 = vpop.eup %5277  ;;  %v5136_v34 = vld [vmem:[%s6759_s2 + $0xc0] sm:$0xff]   ;;  %v5139_v38 = vld [vmem:[%s6760_s3 + $0x30] sm:$0xff]   ;;  %v5142_v42 = vld [vmem:[%s6760_s3 + $0x68] sm:$0xff]  }
 0x16a   : > { %v613_v46 = vadd.f32 %v5741_v57, %v599_v43  ;;  %4628 = vmatpush3.bf16.msra.mxu0 %v5093_v40  ;;  %4648 = vmatpush3.bf16.msra.mxu1 %v5094_v30  ;;  %v580_v16 = vmul.f32 %v5278_v56, %v5637_v32  ;;  %v5106_v32 = vld [vmem:[%s6759_s2 + $0x78] sm:$0xff]   ;;  %v5131_v30 = vld [vmem:[%s6759_s2 + $0x90] sm:$0xff]   ;;  %v5143_v43 = vld [vmem:[%s6760_s3 + $0x20] sm:$0xff]  }
 0x16b   : > { %v5795_v47 = vpack.c.bf16 %v612_v59, %v611_v35  ;;  %v600_v48 = vmul.f32 %v5734_v44, %v586_v45  ;;  %4629 = vmatprep.subr.bf16.mxu0 %v5095_v41  ;;  %4649 = vmatprep.subr.bf16.mxu1 %v5096_v50  ;;  %v5130_v40 = vld [vmem:[%s6759_s2 + $0xd8] sm:$0xff]   ;;  %v5144_v59 = vld [vmem:[%s6760_s3 + $0x60] sm:$0xff]  }
 0x16c   : > { %v5280_v58 = vpop.eup %5279  ;;  %v594_v2 = vmul.f32 %v5734_v44, %v580_v16  ;;  %v5137_v35 = vld [vmem:[%s6760_s3 + $0x38] sm:$0xff]   ;;  %v5157_v16 = vld [vmem:[%s6760_s3 + $0xa8] sm:$0xff]  }
 0x16d   : > { %v614_v60 = vadd.f32 %v5741_v57, %v600_v48  ;;  %v579_v63 = vmul.f32 %v5280_v58, %v5635_v31  ;;  %v5105_v31 = vld [vmem:[%s6759_s2 + $0x38] sm:$0xff]   ;;  %v5147_v48 = vld [vmem:[%s6760_s3 + $0x10] sm:$0xff]  }
 0x16e   : > { %4630 = vmatpush3.bf16.msra.mxu0 %v5095_v41  ;;  %4650 = vmatpush3.bf16.msra.mxu1 %v5096_v50  ;;  %v608_v4 = vadd.f32 %v5741_v57, %v594_v2  ;;  %v5140_v41 = vld [vmem:[%s6760_s3 + $0x70] sm:$0xff]   ;;  %v5141_v50 = vld [vmem:[%s6760_s3 + $0x28] sm:$0xff]   ;;  %v5145_v45 = vld [vmem:[%s6760_s3 + $0x18] sm:$0xff]  }
 0x16f   : > { %v5805_v53 = vpack.c.bf16 %v614_v60, %v613_v46  ;;  %4631 = vmatprep.subr.bf16.mxu0 %v5097_v51  ;;  %4651 = vmatprep.subr.bf16.mxu1 %v5098_v52  ;;  %v593_v3 = vmul.f32 %v5734_v44, %v579_v63  ;;  %v5146_v46 = vld [vmem:[%s6760_s3 + $0x58] sm:$0xff]   ;;  %v5150_v60 = vld [vmem:[%s6760_s3 + $0x48] sm:$0xff]  }
 0x170   : > { %v5153_v56 = vld [vmem:[%s6760_s3 + $0xb8] sm:$0xff]   ;;  %v5158_v63 = vld [vmem:[%s6760_s3 + $0xe8] sm:$0xff]  }
 0x171   : > { %v607_v5 = vadd.f32 %v5741_v57, %v593_v3  ;;  %v5109_v57 = vld [vmem:[%s6759_s2 + $0x28] sm:$0xff]   ;;  %v5154_v58 = vld [vmem:[%s6760_s3 + $0xf8] sm:$0xff]  }
 0x172   : > { %4632 = vmatpush3.bf16.msra.mxu0 %v5097_v51  ;;  %4652 = vmatpush3.bf16.msra.mxu1 %v5098_v52  ;;  %v5148_v51 = vld [vmem:[%s6760_s3 + $0x50] sm:$0xff]   ;;  %v5149_v52 = vld [vmem:[%s6760_s3 + $0x8] sm:$0xff]   ;;  %v5161_v2 = vld [vmem:[%s6760_s3 + $0x98] sm:$0xff]  }
 0x173   : > { %4633 = vmatprep.subr.bf16.mxu0 %v5099_v54  ;;  %4653 = vmatprep.subr.bf16.mxu1 %v5100_v55  ;;  %v5837_v44 = vpack.c.bf16 %v608_v4, %v607_v5  ;;  %v5162_v3 = vld [vmem:[%s6760_s3 + $0xd8] sm:$0xff]   ;;  %v5165_v4 = vld [vmem:[%s6760_s3 + $0x88] sm:$0xff]  }
 0x174   : > { %v5166_v5 = vld [vmem:[%s6760_s3 + $0xc8] sm:$0xff]  }
 0x176   : > { %4634 = vmatpush3.bf16.msra.mxu0 %v5099_v54  ;;  %4654 = vmatpush3.bf16.msra.mxu1 %v5100_v55  ;;  %v5151_v54 = vld [vmem:[%s6760_s3] sm:$0xff]  }
 0x177   : > { %4635 = vmatprep.subr.bf16.mxu0 %v5101_v61  ;;  %4655 = vmatprep.subr.bf16.mxu1 %v5102_v62  ;;  %v5152_v55 = vld [vmem:[%s6760_s3 + $0x40] sm:$0xff]  }
 0x17a   : > { %4636 = vmatpush3.bf16.msra.mxu0 %v5101_v61  ;;  %4656 = vmatpush3.bf16.msra.mxu1 %v5102_v62  ;;  %v5155_v61 = vld [vmem:[%s6760_s3 + $0xb0] sm:$0xff]  }
 0x17b   : > { %4637 = vmatprep.subr.bf16.mxu0 %v5103_v0  ;;  %4657 = vmatprep.subr.bf16.mxu1 %v5104_v1  ;;  %v5156_v62 = vld [vmem:[%s6760_s3 + $0xf0] sm:$0xff]  }
 0x17e   : > { %4638 = vmatpush3.bf16.msra.mxu0 %v5103_v0  ;;  %4658 = vmatpush3.bf16.msra.mxu1 %v5104_v1  ;;  %v5159_v0 = vld [vmem:[%s6760_s3 + $0xa0] sm:$0xff]  }
 0x17f   : > { %4663 = vmatprep.subr.bf16.mxu0 %v5105_v31  ;;  %4687 = vmatprep.subr.bf16.mxu1 %v5106_v32  ;;  %v5160_v1 = vld [vmem:[%s6760_s3 + $0xe0] sm:$0xff]  }
 0x181   : > { %4640 = vmatmul.mubr.bf16.vlgmr.msra.gmra.mxu0 %v5754_v18  ;;  %4660 = vmatmul.mubr.bf16.vlgmr.msra.gmra.mxu1 %v5754_v18  ;;  %v5118_v18 = vld [vmem:[%s6759_s2 + $0x48] sm:$0xff]  }
 0x182   : > { %4664 = vmatpush3.bf16.msra.mxu0 %v5105_v31  ;;  %4679 = vmatprep.mubr.bf16.mxu0 %v5837_v44  ;;  %v5163_v31 = vld [vmem:[%s6760_s3 + $0x90] sm:$0xff]  }
 0x183   : > { %4688 = vmatpush3.bf16.msra.mxu1 %v5106_v32  ;;  %4703 = vmatprep.mubr.bf16.mxu1 %v5837_v44  ;;  %v5164_v32 = vld [vmem:[%s6760_s3 + $0xd0] sm:$0xff]  }
 0x184   : > { %4665 = vmatprep.subr.bf16.mxu0 %v5107_v6  ;;  %4689 = vmatprep.subr.bf16.mxu1 %v5108_v7 }
 0x186   : > { %4666 = vmatpush3.bf16.msra.mxu0 %v5107_v6  ;;  %v5168_v6 = vld [vmem:[%s6760_s3 + $0xc0] sm:$0xff]  }
 0x187   : > { %4690 = vmatpush3.bf16.msra.mxu1 %v5108_v7  ;;  %4667 = vmatprep.subr.bf16.mxu0 %v5109_v57 }
 0x188   : > { %4691 = vmatprep.subr.bf16.mxu1 %v5110_v23 }
 0x18a   : > { %4668 = vmatpush3.bf16.msra.mxu0 %v5109_v57 }
 0x18b   : > { %4692 = vmatpush3.bf16.msra.mxu1 %v5110_v23  ;;  %4669 = vmatprep.subr.bf16.mxu0 %v5111_v8 }
 0x18c   : > { %4693 = vmatprep.subr.bf16.mxu1 %v5112_v17 }
 0x18e   : > { %4670 = vmatpush3.bf16.msra.mxu0 %v5111_v8 }
 0x18f   : > { %4694 = vmatpush3.bf16.msra.mxu1 %v5112_v17  ;;  %4671 = vmatprep.subr.bf16.mxu0 %v5113_v9 }
 0x190   : > { %4695 = vmatprep.subr.bf16.mxu1 %v5114_v10 }
 0x192   : > { %4672 = vmatpush3.bf16.msra.mxu0 %v5113_v9 }
 0x193   : > { %4696 = vmatpush3.bf16.msra.mxu1 %v5114_v10  ;;  %4673 = vmatprep.subr.bf16.mxu0 %v5115_v11 }
 0x194   : > { %4697 = vmatprep.subr.bf16.mxu1 %v5116_v14 }
 0x196   : > { %4674 = vmatpush3.bf16.msra.mxu0 %v5115_v11 }
 0x197   : > { %4698 = vmatpush3.bf16.msra.mxu1 %v5116_v14  ;;  %4675 = vmatprep.subr.bf16.mxu0 %v5117_v15 }
 0x198   : > { %4699 = vmatprep.subr.bf16.mxu1 %v5118_v18 }
 0x19a   : > { %4676 = vmatpush3.bf16.msra.mxu0 %v5117_v15 }
 0x19b   : > { %4700 = vmatpush3.bf16.msra.mxu1 %v5118_v18  ;;  %4677 = vmatprep.subr.bf16.mxu0 %v5119_v24 }
 0x19c   : > { %4701 = vmatprep.subr.bf16.mxu1 %v5120_v19 }
 0x19e   : > { %4678 = vmatpush3.bf16.msra.mxu0 %v5119_v24 }
 0x19f   : > { %4702 = vmatpush3.bf16.msra.mxu1 %v5120_v19  ;;  %4711 = vmatprep.subr.bf16.mxu0 %v5121_v20 }
 0x1a0   : > { %4735 = vmatprep.subr.bf16.mxu1 %v5122_v21 }
 0x1a1   : > { %4680 = vmatmul.mubr.bf16.vlgmr.msra.gmra.mxu0 %v5782_v37 }
 0x1a2   : > { %4704 = vmatmul.mubr.bf16.vlgmr.msra.gmra.mxu1 %v5782_v37  ;;  %4683 = vmatprep.mubr.bf16.mxu0 %v5795_v47 }
 0x1a3   : > { %4707 = vmatprep.mubr.bf16.mxu1 %v5795_v47  ;;  %4712 = vmatpush3.bf16.msra.mxu0 %v5121_v20 }
 0x1a4   : > { %4736 = vmatpush3.bf16.msra.mxu1 %v5122_v21  ;;  %4713 = vmatprep.subr.bf16.mxu0 %v5123_v22 }
 0x1a5   : > { %4737 = vmatprep.subr.bf16.mxu1 %v5124_v25 }
 0x1a7   : > { %4714 = vmatpush3.bf16.msra.mxu0 %v5123_v22 }
 0x1a8   : > { %4738 = vmatpush3.bf16.msra.mxu1 %v5124_v25  ;;  %4715 = vmatprep.subr.bf16.mxu0 %v5125_v26 }
 0x1a9   : > { %4684 = vmatmul.mubr.bf16.gmra.mxu0 %v5805_v53  ;;  %4739 = vmatprep.subr.bf16.mxu1 %v5126_v39 }
 0x1aa   : > { %4708 = vmatmul.mubr.bf16.gmra.mxu1 %v5805_v53  ;;  %4727 = vmatprep.mubr.bf16.mxu0 %v5837_v44 }
 0x1ab   : > { %4716 = vmatpush3.bf16.msra.mxu0 %v5125_v26  ;;  %4751 = vmatprep.mubr.bf16.mxu1 %v5837_v44 }
 0x1ac   : > { %4740 = vmatpush3.bf16.msra.mxu1 %v5126_v39  ;;  %4717 = vmatprep.subr.bf16.mxu0 %v5127_v27 }
 0x1ad   : > { %4741 = vmatprep.subr.bf16.mxu1 %v5128_v28 }
 0x1af   : > { %4718 = vmatpush3.bf16.msra.mxu0 %v5127_v27 }
 0x1b0   : > { %4742 = vmatpush3.bf16.msra.mxu1 %v5128_v28  ;;  %4719 = vmatprep.subr.bf16.mxu0 %v5129_v29 }
 0x1b1   : > { %4743 = vmatprep.subr.bf16.mxu1 %v5130_v40 }
 0x1b3   : > { %4720 = vmatpush3.bf16.msra.mxu0 %v5129_v29 }
 0x1b4   : > { %4744 = vmatpush3.bf16.msra.mxu1 %v5130_v40  ;;  %4721 = vmatprep.subr.bf16.mxu0 %v5131_v30 }
 0x1b5   : > { %4745 = vmatprep.subr.bf16.mxu1 %v5132_v33 }
 0x1b7   : > { %4722 = vmatpush3.bf16.msra.mxu0 %v5131_v30 }
 0x1b8   : > { %4746 = vmatpush3.bf16.msra.mxu1 %v5132_v33  ;;  %4723 = vmatprep.subr.bf16.mxu0 %v5133_v49 }
 0x1b9   : > { %4747 = vmatprep.subr.bf16.mxu1 %v5134_v12 }
 0x1bb   : > { %4724 = vmatpush3.bf16.msra.mxu0 %v5133_v49 }
 0x1bc   : > { %4748 = vmatpush3.bf16.msra.mxu1 %v5134_v12  ;;  %4725 = vmatprep.subr.bf16.mxu0 %v5135_v13 }
 0x1bd   : > { %4749 = vmatprep.subr.bf16.mxu1 %v5136_v34 }
 0x1bf   : > { %4726 = vmatpush3.bf16.msra.mxu0 %v5135_v13 }
 0x1c0   : > { %4750 = vmatpush3.bf16.msra.mxu1 %v5136_v34  ;;  %4759 = vmatprep.subr.bf16.mxu0 %v5137_v35 }
 0x1c1   : > { %4783 = vmatprep.subr.bf16.mxu1 %v5138_v36 }
 0x1c2   : > { %4728 = vmatmul.mubr.bf16.vlgmr.msra.gmra.mxu0 %v5782_v37 }
 0x1c3   : > { %4752 = vmatmul.mubr.bf16.vlgmr.msra.gmra.mxu1 %v5782_v37  ;;  %4731 = vmatprep.mubr.bf16.mxu0 %v5795_v47 }
 0x1c4   : > { %4755 = vmatprep.mubr.bf16.mxu1 %v5795_v47  ;;  %4760 = vmatpush3.bf16.msra.mxu0 %v5137_v35 }
 0x1c5   : > { %4784 = vmatpush3.bf16.msra.mxu1 %v5138_v36  ;;  %4761 = vmatprep.subr.bf16.mxu0 %v5139_v38 }
 0x1c6   : > { %4785 = vmatprep.subr.bf16.mxu1 %v5140_v41 }
 0x1c8   : > { %4762 = vmatpush3.bf16.msra.mxu0 %v5139_v38 }
 0x1c9   : > { %4786 = vmatpush3.bf16.msra.mxu1 %v5140_v41  ;;  %4763 = vmatprep.subr.bf16.mxu0 %v5141_v50 }
 0x1ca   : > { %4732 = vmatmul.mubr.bf16.gmra.mxu0 %v5805_v53  ;;  %4787 = vmatprep.subr.bf16.mxu1 %v5142_v42 }
 0x1cb   : > { %4756 = vmatmul.mubr.bf16.gmra.mxu1 %v5805_v53  ;;  %4775 = vmatprep.mubr.bf16.mxu0 %v5837_v44 }
 0x1cc   : > { %4764 = vmatpush3.bf16.msra.mxu0 %v5141_v50  ;;  %4799 = vmatprep.mubr.bf16.mxu1 %v5837_v44 }
 0x1cd   : > { %4788 = vmatpush3.bf16.msra.mxu1 %v5142_v42  ;;  %4765 = vmatprep.subr.bf16.mxu0 %v5143_v43 }
 0x1ce   : > { %4789 = vmatprep.subr.bf16.mxu1 %v5144_v59 }
 0x1d0   : > { %4766 = vmatpush3.bf16.msra.mxu0 %v5143_v43 }
 0x1d1   : > { %4790 = vmatpush3.bf16.msra.mxu1 %v5144_v59  ;;  %4767 = vmatprep.subr.bf16.mxu0 %v5145_v45 }
 0x1d2   : > { %4791 = vmatprep.subr.bf16.mxu1 %v5146_v46 }
 0x1d4   : > { %4768 = vmatpush3.bf16.msra.mxu0 %v5145_v45 }
 0x1d5   : > { %4792 = vmatpush3.bf16.msra.mxu1 %v5146_v46  ;;  %4769 = vmatprep.subr.bf16.mxu0 %v5147_v48 }
 0x1d6   : > { %4793 = vmatprep.subr.bf16.mxu1 %v5148_v51 }
 0x1d8   : > { %4770 = vmatpush3.bf16.msra.mxu0 %v5147_v48 }
 0x1d9   : > { %4794 = vmatpush3.bf16.msra.mxu1 %v5148_v51  ;;  %4771 = vmatprep.subr.bf16.mxu0 %v5149_v52 }
 0x1da   : > { %4795 = vmatprep.subr.bf16.mxu1 %v5150_v60 }
 0x1dc   : > { %4772 = vmatpush3.bf16.msra.mxu0 %v5149_v52 }
 0x1dd   : > { %4796 = vmatpush3.bf16.msra.mxu1 %v5150_v60  ;;  %4773 = vmatprep.subr.bf16.mxu0 %v5151_v54 }
 0x1de   : > { %4797 = vmatprep.subr.bf16.mxu1 %v5152_v55 }
 0x1e0   : > { %4774 = vmatpush3.bf16.msra.mxu0 %v5151_v54 }
 0x1e1   : > { %4798 = vmatpush3.bf16.msra.mxu1 %v5152_v55  ;;  %4807 = vmatprep.subr.bf16.mxu0 %v5153_v56 }
 0x1e2   : > { %4831 = vmatprep.subr.bf16.mxu1 %v5154_v58 }
 0x1e3   : > { %4776 = vmatmul.mubr.bf16.vlgmr.msra.gmra.mxu0 %v5782_v37 }
 0x1e4   : > { %4800 = vmatmul.mubr.bf16.vlgmr.msra.gmra.mxu1 %v5782_v37  ;;  %4779 = vmatprep.mubr.bf16.mxu0 %v5795_v47 }
 0x1e5   : > { %4803 = vmatprep.mubr.bf16.mxu1 %v5795_v47  ;;  %4808 = vmatpush3.bf16.msra.mxu0 %v5153_v56 }
 0x1e6   : > { %4832 = vmatpush3.bf16.msra.mxu1 %v5154_v58  ;;  %4809 = vmatprep.subr.bf16.mxu0 %v5155_v61 }
 0x1e7   : > { %4833 = vmatprep.subr.bf16.mxu1 %v5156_v62 }
 0x1e9   : > { %4810 = vmatpush3.bf16.msra.mxu0 %v5155_v61 }
 0x1ea   : > { %4834 = vmatpush3.bf16.msra.mxu1 %v5156_v62  ;;  %4811 = vmatprep.subr.bf16.mxu0 %v5157_v16 }
 0x1eb   : > { %4780 = vmatmul.mubr.bf16.gmra.mxu0 %v5805_v53  ;;  %4835 = vmatprep.subr.bf16.mxu1 %v5158_v63 }
 0x1ec   : > { %4804 = vmatmul.mubr.bf16.gmra.mxu1 %v5805_v53  ;;  %4823 = vmatprep.mubr.bf16.mxu0 %v5837_v44 }
 0x1ed   : > { %4812 = vmatpush3.bf16.msra.mxu0 %v5157_v16  ;;  %4847 = vmatprep.mubr.bf16.mxu1 %v5837_v44  ;;  %v5167_v44 = vld [vmem:[%s6760_s3 + $0x80] sm:$0xff]  }
 0x1ee   : > { %4836 = vmatpush3.bf16.msra.mxu1 %v5158_v63  ;;  %4813 = vmatprep.subr.bf16.mxu0 %v5159_v0 }
 0x1ef   : > { %4837 = vmatprep.subr.bf16.mxu1 %v5160_v1 }
 0x1f1   : > { %4814 = vmatpush3.bf16.msra.mxu0 %v5159_v0 }
 0x1f2   : > { %4838 = vmatpush3.bf16.msra.mxu1 %v5160_v1  ;;  %4815 = vmatprep.subr.bf16.mxu0 %v5161_v2 }
 0x1f3   : > { %4839 = vmatprep.subr.bf16.mxu1 %v5162_v3 }
 0x1f5   : > { %4816 = vmatpush3.bf16.msra.mxu0 %v5161_v2 }
 0x1f6   : > { %4840 = vmatpush3.bf16.msra.mxu1 %v5162_v3  ;;  %4817 = vmatprep.subr.bf16.mxu0 %v5163_v31 }
 0x1f7   : > { %4841 = vmatprep.subr.bf16.mxu1 %v5164_v32 }
 0x1f9   : > { %4818 = vmatpush3.bf16.msra.mxu0 %v5163_v31 }
 0x1fa   : > { %4842 = vmatpush3.bf16.msra.mxu1 %v5164_v32  ;;  %4819 = vmatprep.subr.bf16.mxu0 %v5165_v4 }
 0x1fb   : > { %4843 = vmatprep.subr.bf16.mxu1 %v5166_v5 }
 0x1fd   : > { %4820 = vmatpush3.bf16.msra.mxu0 %v5165_v4 }
 0x1fe   : > { %4844 = vmatpush3.bf16.msra.mxu1 %v5166_v5  ;;  %4821 = vmatprep.subr.bf16.mxu0 %v5167_v44 }
 0x1ff   : > { %4845 = vmatprep.subr.bf16.mxu1 %v5168_v6 }
 0x201   : > { %4822 = vmatpush3.bf16.msra.mxu0 %v5167_v44 }
 0x202   : > { %4846 = vmatpush3.bf16.msra.mxu1 %v5168_v6 }
 0x204   : > { %4824 = vmatmul.mubr.bf16.vlgmr.msra.gmra.mxu0 %v5782_v37 }
 0x205   : > { %4848 = vmatmul.mubr.bf16.vlgmr.msra.gmra.mxu1 %v5782_v37  ;;  %4827 = vmatprep.mubr.bf16.mxu0 %v5795_v47 }
 0x206   : > { %4851 = vmatprep.mubr.bf16.mxu1 %v5795_v47 }
 0x20c   : > { %4828 = vmatmul.mubr.bf16.gmra.mxu0 %v5805_v53 }
 0x20d   : > { %4852 = vmatmul.mubr.bf16.gmra.mxu1 %v5805_v53 }
 0x221   : > { %v4601_v7 = vpop.f32.mrf.mxu0  ;;  %v4621_v57 = vpop.f32.mrf.mxu1 }
 0x222   : > { %v6059_v17 = vmul.f32 0.088388346, %v4601_v7  ;;  %v6061_v11 = vmul.f32 0.088388346, %v4621_v57 }
 0x223   : > { %v819_v23 = vpop.f32.mrf.mxu0  ;;  %v916_v8 = vpop.f32.mrf.mxu1 }
 0x224   : > { %v2157_v15 = vmul.f32 0.088388346, %v819_v23  ;;  %v2161_v47 = vmul.f32 0.088388346, %v916_v8 }
 0x225   : > { %v4602_v9 = vpop.f32.mrf.mxu0  ;;  %v4622_v10 = vpop.f32.mrf.mxu1 }
 0x226   : > { %v6063_v14 = vmul.f32 0.088388346, %v4602_v9  ;;  %v6065_v37 = vmul.f32 0.088388346, %v4622_v10 }
 0x227   : > { %v822_v18 = vpop.f32.mrf.mxu0  ;;  %v919_v24 = vpop.f32.mrf.mxu1 }
 0x228   : > { %v2174_v53 = vpack.c.bf16 %v6063_v14, %v6059_v17  ;;  %v2176_v19 = vpack.c.bf16 %v6065_v37, %v6061_v11  ;;  %v2158_v20 = vmul.f32 0.088388346, %v822_v18  ;;  %v2162_v21 = vmul.f32 0.088388346, %v919_v24 }
 0x22a   : > { %v2173_v22 = vpack.c.bf16 %v2158_v20, %v2157_v15  ;;  %v2175_v25 = vpack.c.bf16 %v2162_v21, %v2161_v47 }
 0x22c   : > { %4863 = vmatprep.mubr.msk.bf16.mxu0 %vm2197_vm0, %v2173_v22  ;;  %4875 = vmatprep.mubr.msk.bf16.mxu1 %vm2197_vm0, %v2175_v25 }
 0x241   : > { %v4641_v26 = vpop.f32.mrf.mxu0  ;;  %v4661_v39 = vpop.f32.mrf.mxu1 }
 0x242   : > { %v6077_v29 = vmul.f32 0.088388346, %v4641_v26  ;;  %v6079_v33 = vmul.f32 0.088388346, %v4661_v39 }
 0x243   : > { %v6073_v27 = vpop.f32.mrf.mxu0  ;;  %v6075_v28 = vpop.f32.mrf.mxu1 }
 0x245   : > { %v4642_v40 = vpop.f32.mrf.mxu0  ;;  %v4662_v30 = vpop.f32.mrf.mxu1 }
 0x246   : > { %v6081_v49 = vmul.f32 0.088388346, %v4642_v40  ;;  %v6083_v12 = vmul.f32 0.088388346, %v4662_v30  ;;  %v2165_v30 = vmul.f32 0.088388346, %v6073_v27 }
 0x247   : > { %v1016_v35 = vpop.f32.mrf.mxu0  ;;  %v1113_v36 = vpop.f32.mrf.mxu1 }
 0x248   : > { %v2178_v13 = vpack.c.bf16 %v6081_v49, %v6077_v29  ;;  %v2180_v34 = vpack.c.bf16 %v6083_v12, %v6079_v33  ;;  %v2166_v25 = vmul.f32 0.088388346, %v1016_v35  ;;  %v2170_v39 = vmul.f32 0.088388346, %v1113_v36 }
 0x261   : > { %v4681_v38 = vpop.f32.mrf.mxu0 }
 0x262   : > { %v4705_v41 = vpop.f32.mrf.mxu1 }
 0x263   : > { %v1271_v50 = vpop.f32.mrf.mxu0 }
 0x264   : > { %v1384_v42 = vpop.f32.mrf.mxu1 }
 0x265   : > { %v4682_v43 = vpop.f32.mrf.mxu0 }
 0x266   : > { %v4706_v59 = vpop.f32.mrf.mxu1  ;;  %v2182_v2 = vpack.c.bf16 %v4682_v43, %v4681_v38 }
 0x267   : > { %v1274_v45 = vpop.f32.mrf.mxu0  ;;  %v2186_v31 = vpack.c.bf16 %v4706_v59, %v4705_v41  ;;  %v2177_v59 = vpack.c.bf16 %v2166_v25, %v2165_v30 }
 0x268   : > { %v1387_v46 = vpop.f32.mrf.mxu1  ;;  %v2208_v4 = vsel %vm2197_vm0, %v2182_v2, 0  ;;  %v2181_v5 = vpack.c.bf16 %v1274_v45, %v1271_v50  ;;  %v2169_v50 = vmul.f32 0.088388346, %v6075_v28 }
 0x269   : > { %v4685_v48 = vpop.f32.mrf.mxu0  ;;  %v2275_v44 = vsel %vm2197_vm0, %v2186_v31, 0  ;;  %v2185_v6 = vpack.c.bf16 %v1387_v46, %v1384_v42 }
 0x26a   : > { %v4709_v51 = vpop.f32.mrf.mxu1  ;;  %v2205_v15 = vsel %vm2197_vm0, %v2181_v5, 0  ;;  %v2179_v27 = vpack.c.bf16 %v2170_v39, %v2169_v50  ;;  %v2466_v50 = vlaneseq }
 0x26b   : > { %v1287_v52 = vpop.f32.mrf.mxu0  ;;  %v2272_v18 = vsel %vm2197_vm0, %v2185_v6, 0 }
 0x26c   : > { %v1400_v60 = vpop.f32.mrf.mxu1 }
 0x26d   : > { %v4686_v54 = vpop.f32.mrf.mxu0 }
 0x26e   : > { %v2184_v55 = vpack.c.bf16 %v4686_v54, %v4685_v48  ;;  %v4710_v56 = vpop.f32.mrf.mxu1 }
 0x26f   : > { %v2188_v58 = vpack.c.bf16 %v4710_v56, %v4709_v51  ;;  %v1290_v61 = vpop.f32.mrf.mxu0 }
 0x270   : > { %v2214_v62 = vsel %vm2197_vm0, %v2184_v55, 0  ;;  %v2183_v16 = vpack.c.bf16 %v1290_v61, %v1287_v52  ;;  %v1403_v63 = vpop.f32.mrf.mxu1  ;;  %4983 = vmatprep.subr.msk.bf16.mxu0 %vm2197_vm0, %v2184_v55 }
 0x271   : > { %v2281_v0 = vsel %vm2197_vm0, %v2188_v58, 0  ;;  %v2187_v1 = vpack.c.bf16 %v1403_v63, %v1400_v60  ;;  %4987 = vmatprep.subr.msk.bf16.mxu1 %vm2197_vm0, %v2188_v58  ;;  %4856 = vmatpush3.bf16.xpose.msra.mxu0 %v2214_v62 }
 0x272   : > { %4868 = vmatpush3.bf16.xpose.msra.mxu1 %v2281_v0  ;;  %4984 = vmatprep.subr.msk.bf16.mxu0 %vm2197_vm0, %v2183_v16  ;;  %v2211_v3 = vsel %vm2197_vm0, %v2183_v16, 0 }
 0x273   : > { %4988 = vmatprep.subr.msk.bf16.mxu1 %vm2197_vm0, %v2187_v1  ;;  %v2278_v32 = vsel %vm2197_vm0, %v2187_v1, 0 }
 0x279   : > { %4858 = vmatpush3.bf16.xpose.msra.mxu0 %v2211_v3 }
 0x27a   : > { %4870 = vmatpush3.bf16.xpose.msra.mxu1 %v2278_v32  ;;  %4985 = vmatprep.subr.msk.bf16.mxu0 %vm2197_vm0, %v2182_v2 }
 0x27b   : > { %4989 = vmatprep.subr.msk.bf16.mxu1 %vm2197_vm0, %v2186_v31 }
 0x281   : > { %4860 = vmatpush3.bf16.xpose.msra.mxu0 %v2208_v4 }
 0x282   : > { %v4729_v7 = vpop.f32.mrf.mxu0  ;;  %4872 = vmatpush3.bf16.xpose.msra.mxu1 %v2275_v44  ;;  %4986 = vmatprep.subr.msk.bf16.mxu0 %vm2197_vm0, %v2181_v5 }
 0x283   : > { %v4753_v57 = vpop.f32.mrf.mxu1  ;;  %4990 = vmatprep.subr.msk.bf16.mxu1 %vm2197_vm0, %v2185_v6 }
 0x284   : > { %v1497_v23 = vpop.f32.mrf.mxu0 }
 0x285   : > { %v1610_v8 = vpop.f32.mrf.mxu1 }
 0x286   : > { %v4730_v9 = vpop.f32.mrf.mxu0 }
 0x287   : > { %v4754_v10 = vpop.f32.mrf.mxu1  ;;  %v2190_v17 = vpack.c.bf16 %v4730_v9, %v4729_v7 }
 0x288   : > { %v1500_v47 = vpop.f32.mrf.mxu0  ;;  %v2194_v14 = vpack.c.bf16 %v4754_v10, %v4753_v57 }
 0x289   : > { %v1613_v24 = vpop.f32.mrf.mxu1  ;;  %4862 = vmatpush3.bf16.xpose.msra.mxu0 %v2205_v15 }
 0x28a   : > { %v4733_v20 = vpop.f32.mrf.mxu0  ;;  %4874 = vmatpush3.bf16.xpose.msra.mxu1 %v2272_v18  ;;  %v2409_v48 = vsel %vm2197_vm0, %v2194_v14, 0  ;;  %v2193_v51 = vpack.c.bf16 %v1613_v24, %v1610_v8 }
 0x28b   : > { %v4757_v21 = vpop.f32.mrf.mxu1 }
 0x28c   : > { %v1513_v22 = vpop.f32.mrf.mxu0  ;;  %v2406_v16 = vsel %vm2197_vm0, %v2193_v51, 0 }
 0x28d   : > { %v1626_v26 = vpop.f32.mrf.mxu1 }
 0x28e   : > { %v4734_v40 = vpop.f32.mrf.mxu0 }
 0x28f   : > { %v2192_v38 = vpack.c.bf16 %v4734_v40, %v4733_v20  ;;  %v4758_v41 = vpop.f32.mrf.mxu1 }
 0x290   : > { %v2196_v42 = vpack.c.bf16 %v4758_v41, %v4757_v21  ;;  %v1516_v43 = vpop.f32.mrf.mxu0  ;;  %4864 = vmatmul.mubr.msk.bf16.vlgmr.msra.gmra.mxu0 %vm2197_vm0, %v2174_v53  ;;  %v2342_v53 = vsel %vm2197_vm0, %v2190_v17, 0 }
 0x291   : > { %v2348_v45 = vsel %vm2197_vm0, %v2192_v38, 0  ;;  %v2191_v35 = vpack.c.bf16 %v1516_v43, %v1513_v22  ;;  %v1629_v46 = vpop.f32.mrf.mxu1  ;;  %4876 = vmatmul.mubr.msk.bf16.vlgmr.msra.gmra.mxu1 %vm2197_vm0, %v2176_v19  ;;  %4991 = vmatprep.subr.msk.bf16.mxu0 %vm2197_vm0, %v2192_v38  ;;  %v2189_v19 = vpack.c.bf16 %v1500_v47, %v1497_v23 }
 0x292   : > { %v2415_v28 = vsel %vm2197_vm0, %v2196_v42, 0  ;;  %v2195_v36 = vpack.c.bf16 %v1629_v46, %v1626_v26  ;;  %4995 = vmatprep.subr.msk.bf16.mxu1 %vm2197_vm0, %v2196_v42  ;;  %4880 = vmatpush3.bf16.xpose.msra.mxu0 %v2348_v45  ;;  %v6159_v42 = vshrl.u32 %v2466_v50, 7 }
 0x293   : > { %4887 = vmatprep.mubr.msk.bf16.mxu0 %vm2197_vm0, %v2177_v59  ;;  %4892 = vmatpush3.bf16.xpose.msra.mxu1 %v2415_v28  ;;  %v2345_v11 = vsel %vm2197_vm0, %v2191_v35, 0  ;;  %v2339_v61 = vsel %vm2197_vm0, %v2189_v19, 0  ;;  %v2471_v59 = vstv %s4121_s22 }
 0x294   : > { %4899 = vmatprep.mubr.msk.bf16.mxu1 %vm2197_vm0, %v2179_v27  ;;  %4992 = vmatprep.subr.msk.bf16.mxu0 %vm2197_vm0, %v2191_v35  ;;  %v2412_v37 = vsel %vm2197_vm0, %v2195_v36, 0  ;;  %v2469_v43 = vadd.s32 16, %v6159_v42  ;;  %v6166_v35 = vand.u32 127, %v2466_v50  ;;  %v2470_v46 = vadd.s32 24, %v6159_v42 }
 0x295   : > { %4996 = vmatprep.subr.msk.bf16.mxu1 %vm2197_vm0, %v2195_v36 }
 0x296   : > { %v6164_v45 = vadd.s32 %v2471_v59, %v2469_v43  ;;  %v6173_v28 = vadd.s32 %v2471_v59, %v2470_v46 }
 0x298   : > { %vm2480_vm1 = vcmp.le.s32.totalorder %v6166_v35, %v6164_v45  ;;  %vm2481_vm3 = vcmp.le.s32.totalorder %v6166_v35, %v6173_v28 }
 0x29a   : > { %4882 = vmatpush3.bf16.xpose.msra.mxu0 %v2345_v11  ;;  %v2472_v11 = vadd.s32 %v2471_v59, %v6159_v42 }
 0x29b   : > { %4894 = vmatpush3.bf16.xpose.msra.mxu1 %v2412_v37  ;;  %4993 = vmatprep.subr.msk.bf16.mxu0 %vm2197_vm0, %v2190_v17 }
 0x29c   : > { %4997 = vmatprep.subr.msk.bf16.mxu1 %vm2197_vm0, %v2194_v14  ;;  %v2468_v14 = vadd.s32 8, %v6159_v42  ;;  %vm2478_vm4 = vcmp.le.s32.totalorder %v6166_v35, %v2472_v11 }
 0x2a2   : > { %4884 = vmatpush3.bf16.xpose.msra.mxu0 %v2342_v53 }
 0x2a3   : > { %v4777_v52 = vpop.f32.mrf.mxu0  ;;  %4896 = vmatpush3.bf16.xpose.msra.mxu1 %v2409_v48  ;;  %4994 = vmatprep.subr.msk.bf16.mxu0 %vm2197_vm0, %v2189_v19 }
 0x2a4   : > { %v4801_v60 = vpop.f32.mrf.mxu1  ;;  %4998 = vmatprep.subr.msk.bf16.mxu1 %vm2197_vm0, %v2193_v51 }
 0x2a5   : > { %v1787_v54 = vpop.f32.mrf.mxu0 }
 0x2a6   : > { %v1900_v55 = vpop.f32.mrf.mxu1 }
 0x2a7   : > { %v4778_v56 = vpop.f32.mrf.mxu0 }
 0x2a8   : > { %v4802_v58 = vpop.f32.mrf.mxu1  ;;  %v2684_v23 = vpack.c.bf16 %v4778_v56, %v4777_v52 }
 0x2a9   : > { %v1790_v62 = vpop.f32.mrf.mxu0  ;;  %v2688_v8 = vpack.c.bf16 %v4802_v58, %v4801_v60 }
 0x2aa   : > { %v1903_v63 = vpop.f32.mrf.mxu1  ;;  %4886 = vmatpush3.bf16.xpose.msra.mxu0 %v2339_v61  ;;  %v2683_v29 = vpack.c.bf16 %v1790_v62, %v1787_v54  ;;  %v2473_v54 = vadd.s32 %v2471_v59, %v2468_v14 }
 0x2ab   : > { %v4781_v0 = vpop.f32.mrf.mxu0  ;;  %4898 = vmatpush3.bf16.xpose.msra.mxu1 %v2406_v16  ;;  %v2687_v49 = vpack.c.bf16 %v1903_v63, %v1900_v55 }
 0x2ac   : > { %v4805_v1 = vpop.f32.mrf.mxu1  ;;  %vm2479_vm5 = vcmp.le.s32.totalorder %v6166_v35, %v2473_v54 }
 0x2ad   : > { %v1803_v2 = vpop.f32.mrf.mxu0 }
 0x2ae   : > { %v1916_v3 = vpop.f32.mrf.mxu1 }
 0x2af   : > { %v4782_v31 = vpop.f32.mrf.mxu0 }
 0x2b0   : > { %v2686_v32 = vpack.c.bf16 %v4782_v31, %v4781_v0  ;;  %v4806_v4 = vpop.f32.mrf.mxu1 }
 0x2b1   : > { %v2690_v5 = vpack.c.bf16 %v4806_v4, %v4805_v1  ;;  %v1806_v44 = vpop.f32.mrf.mxu0  ;;  %4888 = vmatmul.mubr.msk.bf16.vlgmr.msra.gmra.mxu0 %vm2197_vm0, %v2178_v13 }
 0x2b2   : > { %v2685_v6 = vpack.c.bf16 %v1806_v44, %v1803_v2  ;;  %v1919_v7 = vpop.f32.mrf.mxu1  ;;  %4900 = vmatmul.mubr.msk.bf16.vlgmr.msra.gmra.mxu1 %vm2197_vm0, %v2180_v34  ;;  %4903 = vmatprep.subr.bf16.mxu0 %v2686_v32 }
 0x2b3   : > { %v2689_v57 = vpack.c.bf16 %v1919_v7, %v1916_v3  ;;  %4915 = vmatprep.subr.bf16.mxu1 %v2690_v5  ;;  %4904 = vmatpush3.bf16.msra.mxu0 %v2686_v32 }
 0x2b4   : > { %4916 = vmatpush3.bf16.msra.mxu1 %v2690_v5  ;;  %4905 = vmatprep.subr.bf16.mxu0 %v2685_v6 }
 0x2b5   : > { %4917 = vmatprep.subr.bf16.mxu1 %v2689_v57 }
 0x2b7   : > { %4906 = vmatpush3.bf16.msra.mxu0 %v2685_v6 }
 0x2b8   : > { %4918 = vmatpush3.bf16.msra.mxu1 %v2689_v57  ;;  %4907 = vmatprep.subr.bf16.mxu0 %v2684_v23 }
 0x2b9   : > { %4919 = vmatprep.subr.bf16.mxu1 %v2688_v8 }
 0x2bb   : > { %4908 = vmatpush3.bf16.msra.mxu0 %v2684_v23 }
 0x2bc   : > { %4920 = vmatpush3.bf16.msra.mxu1 %v2688_v8  ;;  %4909 = vmatprep.subr.bf16.mxu0 %v2683_v29 }
 0x2bd   : > { %4921 = vmatprep.subr.bf16.mxu1 %v2687_v49 }
 0x2bf   : > { %4910 = vmatpush3.bf16.msra.mxu0 %v2683_v29 }
 0x2c0   : > { %4922 = vmatpush3.bf16.msra.mxu1 %v2687_v49 }
 0x2c4   : > { %v4825_v33 = vpop.f32.mrf.mxu0 }
 0x2c5   : > { %v4849_v12 = vpop.f32.mrf.mxu1 }
 0x2c6   : > { %v2013_v13 = vpop.f32.mrf.mxu0 }
 0x2c7   : > { %v2126_v34 = vpop.f32.mrf.mxu1 }
 0x2c8   : > { %v4826_v9 = vpop.f32.mrf.mxu0 }
 0x2c9   : > { %v6141_v10 = vpack.c.bf16 %v4826_v9, %v4825_v33  ;;  %v4850_v15 = vpop.f32.mrf.mxu1 }
 0x2ca   : > { %v6143_v47 = vpack.c.bf16 %v4850_v15, %v4849_v12  ;;  %v2016_v18 = vpop.f32.mrf.mxu0 }
 0x2cb   : > { %v6145_v24 = vpack.c.bf16 %v2016_v18, %v2013_v13  ;;  %v2129_v20 = vpop.f32.mrf.mxu1 }
 0x2cc   : > { %v6147_v21 = vpack.c.bf16 %v2129_v20, %v2126_v34  ;;  %v4829_v22 = vpop.f32.mrf.mxu0 }
 0x2cd   : > { %v4853_v25 = vpop.f32.mrf.mxu1 }
 0x2ce   : > { %v6149_v26 = vpop.f32.mrf.mxu0 }
 0x2cf   : > { %v6151_v39 = vpop.f32.mrf.mxu1 }
 0x2d0   : > { %v4830_v40 = vpop.f32.mrf.mxu0 }
 0x2d1   : > { %v6153_v30 = vpack.c.bf16 %v4830_v40, %v4829_v22  ;;  %v4854_v38 = vpop.f32.mrf.mxu1 }
 0x2d2   : > { %v6155_v41 = vpack.c.bf16 %v4854_v38, %v4853_v25  ;;  %v6169_v27 = vpop.f32.mrf.mxu0 }
 0x2d3   : > { %4927 = vmatprep.subr.bf16.mxu0 %v6153_v30  ;;  %v6175_v36 = vpop.f32.mrf.mxu1 }
 0x2d4   : > { %4939 = vmatprep.subr.bf16.mxu1 %v6155_v41 }
 0x350   : > { %v4865_v17 = vpop.f32.mrf.mxu0 }
 0x351   : > { %v6182_v37 = vsel %vm2480_vm1, %v4865_v17, -inf  ;;  %v4877_v53 = vpop.f32.mrf.mxu1 }
 0x352   : > { %v2250_v19 = vpop.f32.mrf.mxu0  ;;  %v2505_v48 = vsel %vm2498_vm2, %v6182_v37, -inf  ;;  %v6191_v51 = vsel %vm2480_vm1, %v4877_v53, -inf }
 0x353   : > { %v2317_v52 = vpop.f32.mrf.mxu1  ;;  %2506 = vmax.xlane.f32.xlu0 %v2505_v48  ;;  %v2517_v58 = vsel %vm2498_vm2, %v6191_v51, -inf  ;;  %v6205_v62 = vsel %vm2478_vm4, %v2250_v19, -inf }
 0x354   : > { %v4866_v60 = vpop.f32.mrf.mxu0  ;;  %v2499_v0 = vsel %vm2498_vm2, %v6205_v62, -inf  ;;  %v6219_v2 = vsel %vm2478_vm4, %v2317_v52, -inf }
 0x355   : > { %v6197_v55 = vsel %vm2481_vm3, %v4866_v60, -inf  ;;  %v4878_v56 = vpop.f32.mrf.mxu1  ;;  %v2511_v32 = vsel %vm2498_vm2, %v6219_v2, -inf }
 0x356   : > { %v2508_v61 = vsel %vm2498_vm2, %v6197_v55, -inf  ;;  %v6210_v16 = vsel %vm2481_vm3, %v4878_v56, -inf  ;;  %v2253_v63 = vpop.f32.mrf.mxu0 }
 0x357   : > { %2518 = vmax.xlane.f32.xlu0 %v2517_v58  ;;  %2509 = vmax.xlane.f32.xlu1 %v2508_v61  ;;  %v2520_v1 = vsel %vm2498_vm2, %v6210_v16, -inf  ;;  %v6223_v3 = vsel %vm2479_vm5, %v2253_v63, -inf  ;;  %v2320_v31 = vpop.f32.mrf.mxu1 }
 0x358   : > { %v2502_v4 = vsel %vm2498_vm2, %v6223_v3, -inf  ;;  %v6231_v5 = vsel %vm2479_vm5, %v2320_v31, -inf }
 0x359   : > { %v2514_v44 = vsel %vm2498_vm2, %v6231_v5, -inf }
 0x35b   : > { %2500 = vmax.xlane.f32.xlu0 %v2499_v0  ;;  %2521 = vmax.xlane.f32.xlu1 %v2520_v1 }
 0x35f   : > { %2512 = vmax.xlane.f32.xlu0 %v2511_v32  ;;  %2503 = vmax.xlane.f32.xlu1 %v2502_v4 }
 0x363   : > { %2515 = vmax.xlane.f32.xlu1 %v2514_v44 }
 0x371   : > { %v4889_v6 = vpop.f32.mrf.mxu0 }
 0x372   : > { %v6238_v7 = vsel %vm2480_vm1, %v4889_v6, -inf  ;;  %v4901_v57 = vpop.f32.mrf.mxu1 }
 0x373   : > { %v2384_v23 = vpop.f32.mrf.mxu0  ;;  %v2529_v8 = vsel %vm2498_vm2, %v6238_v7, -inf  ;;  %v6270_v38 = vsel %vm2480_vm1, %v4901_v57, -inf }
 0x374   : > { %v6244_v29 = vsel %vm2478_vm4, %v2384_v23, -inf  ;;  %v2451_v49 = vpop.f32.mrf.mxu1  ;;  %2530 = vmax.xlane.f32.xlu0 %v2529_v8  ;;  %v2541_v43 = vsel %vm2498_vm2, %v6270_v38, -inf }
 0x375   : > { %v4890_v33 = vpop.f32.mrf.mxu0  ;;  %v2523_v9 = vsel %vm2498_vm2, %v6244_v29, -inf  ;;  %v6257_v18 = vsel %vm2478_vm4, %v2451_v49, -inf }
 0x376   : > { %v6249_v12 = vsel %vm2481_vm3, %v4890_v33, -inf  ;;  %v4902_v13 = vpop.f32.mrf.mxu1  ;;  %v2535_v25 = vsel %vm2498_vm2, %v6257_v18, -inf }
 0x377   : > { %v2387_v34 = vpop.f32.mrf.mxu0  ;;  %v2532_v15 = vsel %vm2498_vm2, %v6249_v12, -inf  ;;  %v6283_v46 = vsel %vm2481_vm3, %v4902_v13, -inf }
 0x378   : > { %v6261_v20 = vsel %vm2479_vm5, %v2387_v34, -inf  ;;  %2524 = vmax.xlane.f32.xlu0 %v2523_v9  ;;  %2533 = vmax.xlane.f32.xlu1 %v2532_v15  ;;  %v2454_v22 = vpop.f32.mrf.mxu1  ;;  %v2544_v45 = vsel %vm2498_vm2, %v6283_v46, -inf }
 0x379   : > { %v2526_v40 = vsel %vm2498_vm2, %v6261_v20, -inf  ;;  %v6274_v50 = vsel %vm2479_vm5, %v2454_v22, -inf }
 0x37a   : > { %v2538_v59 = vsel %vm2498_vm2, %v6274_v50, -inf }
 0x37c   : > { %2536 = vmax.xlane.f32.xlu0 %v2535_v25  ;;  %2527 = vmax.xlane.f32.xlu1 %v2526_v40 }
 0x380   : > { %2542 = vmax.xlane.f32.xlu0 %v2541_v43  ;;  %2539 = vmax.xlane.f32.xlu1 %v2538_v59 }
 0x384   : > { %2545 = vmax.xlane.f32.xlu1 %v2544_v45 }
 0x3dc   : > { %v2507_v17 = vpop.xlane.xlu0 %2506 }
 0x3dd   : > { %v2549_v11 = vsub.f32 %v6182_v37, %v2507_v17 }
 0x3df   : > { %v2567_v14 = vmul.f32 1.442695, %v2549_v11 }
 0x3e0   : > { %v2519_v53 = vpop.xlane.xlu0 %2518  ;;  %v2510_v19 = vpop.xlane.xlu1 %2509 }
 0x3e1   : > { %5281 = vpow2.f32 %v2567_v14  ;;  %v2553_v48 = vsub.f32 %v6191_v51, %v2519_v53  ;;  %v2550_v52 = vsub.f32 %v6197_v55, %v2510_v19 }
 0x3e3   : > { %v2575_v35 = vmul.f32 1.442695, %v2553_v48  ;;  %v2569_v28 = vmul.f32 1.442695, %v2550_v52 }
 0x3e4   : > { %v2501_v60 = vpop.xlane.xlu0 %2500  ;;  %v2522_v54 = vpop.xlane.xlu1 %2521 }
 0x3e5   : > { %5283 = vpow2.f32 %v2575_v35  ;;  %v2547_v56 = vsub.f32 %v6205_v62, %v2501_v60  ;;  %v2554_v58 = vsub.f32 %v6210_v16, %v2522_v54 }
 0x3e6   : > { %5285 = vpow2.f32 %v2569_v28 }
 0x3e7   : > { %v2563_v61 = vmul.f32 1.442695, %v2547_v56  ;;  %v2577_v37 = vmul.f32 1.442695, %v2554_v58 }
 0x3e8   : > { %v2513_v63 = vpop.xlane.xlu0 %2512  ;;  %v2504_v0 = vpop.xlane.xlu1 %2503 }
 0x3e9   : > { %5287 = vpow2.f32 %v2563_v61  ;;  %v2551_v1 = vsub.f32 %v6219_v2, %v2513_v63  ;;  %v2548_v51 = vsub.f32 %v6223_v3, %v2504_v0 }
 0x3ea   : > { %5289 = vpow2.f32 %v2577_v37 }
 0x3eb   : > { %v2571_v55 = vmul.f32 1.442695, %v2551_v1  ;;  %v2565_v31 = vmul.f32 1.442695, %v2548_v51 }
 0x3ec   : > { %v2516_v32 = vpop.xlane.xlu1 %2515 }
 0x3ed   : > { %5291 = vpow2.f32 %v2571_v55  ;;  %v2552_v4 = vsub.f32 %v6231_v5, %v2516_v32 }
 0x3ee   : > { %v6295_v62 = vpop.eup %5281  ;;  %5293 = vpow2.f32 %v2565_v31 }
 0x3ef   : > { %v2573_v16 = vmul.f32 1.442695, %v2552_v4  ;;  %v2601_v44 = vsel %vm2498_vm2, %v6295_v62, 0.0 }
 0x3f0   : > { %2602 = vadd.xlane.f32.xlu0 %v2601_v44 }
 0x3f1   : > { %5295 = vpow2.f32 %v2573_v16 }
 0x3f2   : > { %v6299_v6 = vpop.eup %5283 }
 0x3f3   : > { %v6301_v2 = vpop.eup %5285  ;;  %v2613_v3 = vsel %vm2498_vm2, %v6299_v6, 0.0 }
 0x3f4   : > { %2614 = vadd.xlane.f32.xlu0 %v2613_v3  ;;  %v2604_v5 = vsel %vm2498_vm2, %v6301_v2, 0.0 }
 0x3f5   : > { %2605 = vadd.xlane.f32.xlu1 %v2604_v5 }
 0x3f6   : > { %v6307_v57 = vpop.eup %5287 }
 0x3f7   : > { %v6309_v23 = vpop.eup %5289  ;;  %v2595_v8 = vsel %vm2498_vm2, %v6307_v57, 0.0 }
 0x3f8   : > { %2596 = vadd.xlane.f32.xlu0 %v2595_v8  ;;  %v2616_v49 = vsel %vm2498_vm2, %v6309_v23, 0.0 }
 0x3f9   : > { %2617 = vadd.xlane.f32.xlu1 %v2616_v49 }
 0x3fa   : > { %v6315_v33 = vpop.eup %5291 }
 0x3fb   : > { %v6317_v13 = vpop.eup %5293  ;;  %v2607_v34 = vsel %vm2498_vm2, %v6315_v33, 0.0 }
 0x3fc   : > { %2608 = vadd.xlane.f32.xlu0 %v2607_v34  ;;  %v2598_v9 = vsel %vm2498_vm2, %v6317_v13, 0.0 }
 0x3fd   : > { %v2531_v15 = vpop.xlane.xlu0 %2530  ;;  %2599 = vadd.xlane.f32.xlu1 %v2598_v9 }
 0x3fe   : > { %v6323_v22 = vpop.eup %5295  ;;  %v2557_v25 = vsub.f32 %v6238_v7, %v2531_v15 }
 0x3ff   : > { %v2610_v40 = vsel %vm2498_vm2, %v6323_v22, 0.0 }
 0x400   : > { %v2583_v43 = vmul.f32 1.442695, %v2557_v25 }
 0x401   : > { %v2525_v59 = vpop.xlane.xlu0 %2524  ;;  %v2534_v45 = vpop.xlane.xlu1 %2533  ;;  %2611 = vadd.xlane.f32.xlu1 %v2610_v40 }
 0x402   : > { %5297 = vpow2.f32 %v2583_v43  ;;  %v2555_v17 = vsub.f32 %v6244_v29, %v2525_v59  ;;  %v2558_v11 = vsub.f32 %v6249_v12, %v2534_v45 }
 0x404   : > { %v2579_v14 = vmul.f32 1.442695, %v2555_v17  ;;  %v2585_v53 = vmul.f32 1.442695, %v2558_v11 }
 0x405   : > { %v2537_v19 = vpop.xlane.xlu0 %2536  ;;  %v2528_v48 = vpop.xlane.xlu1 %2527 }
 0x406   : > { %5299 = vpow2.f32 %v2579_v14  ;;  %v2559_v52 = vsub.f32 %v6257_v18, %v2537_v19  ;;  %v2556_v7 = vsub.f32 %v6261_v20, %v2528_v48 }
 0x407   : > { %5301 = vpow2.f32 %v2585_v53 }
 0x408   : > { %v2587_v35 = vmul.f32 1.442695, %v2559_v52  ;;  %v2581_v28 = vmul.f32 1.442695, %v2556_v7 }
 0x409   : > { %v2543_v60 = vpop.xlane.xlu0 %2542  ;;  %v2540_v54 = vpop.xlane.xlu1 %2539 }
 0x40a   : > { %5303 = vpow2.f32 %v2587_v35  ;;  %v2561_v56 = vsub.f32 %v6270_v38, %v2543_v60  ;;  %v2560_v29 = vsub.f32 %v6274_v50, %v2540_v54 }
 0x40b   : > { %5305 = vpow2.f32 %v2581_v28 }
 0x40c   : > { %v2591_v12 = vmul.f32 1.442695, %v2561_v56  ;;  %v2589_v58 = vmul.f32 1.442695, %v2560_v29 }
 0x40d   : > { %v2546_v61 = vpop.xlane.xlu1 %2545 }
 0x40e   : > { %5307 = vpow2.f32 %v2591_v12  ;;  %v2562_v37 = vsub.f32 %v6283_v46, %v2546_v61 }
 0x40f   : > { %v6335_v18 = vpop.eup %5297  ;;  %5309 = vpow2.f32 %v2589_v58 }
 0x410   : > { %v2593_v20 = vmul.f32 1.442695, %v2562_v37  ;;  %v2625_v63 = vsel %vm2498_vm2, %v6335_v18, 0.0 }
 0x411   : > { %2626 = vadd.xlane.f32.xlu0 %v2625_v63 }
 0x412   : > { %5311 = vpow2.f32 %v2593_v20 }
 0x413   : > { %v6339_v0 = vpop.eup %5299 }
 0x414   : > { %v6341_v38 = vpop.eup %5301  ;;  %v2619_v50 = vsel %vm2498_vm2, %v6339_v0, 0.0 }
 0x415   : > { %2620 = vadd.xlane.f32.xlu0 %v2619_v50  ;;  %v2628_v46 = vsel %vm2498_vm2, %v6341_v38, 0.0 }
 0x416   : > { %2629 = vadd.xlane.f32.xlu1 %v2628_v46 }
 0x417   : > { %v6347_v1 = vpop.eup %5303 }
 0x418   : > { %v6349_v51 = vpop.eup %5305  ;;  %v2631_v55 = vsel %vm2498_vm2, %v6347_v1, 0.0 }
 0x419   : > { %2632 = vadd.xlane.f32.xlu0 %v2631_v55  ;;  %v2622_v31 = vsel %vm2498_vm2, %v6349_v51, 0.0 }
 0x41a   : > { %2623 = vadd.xlane.f32.xlu1 %v2622_v31 }
 0x41b   : > { %v6355_v32 = vpop.eup %5307 }
 0x41c   : > { %v6357_v4 = vpop.eup %5309  ;;  %v2637_v16 = vsel %vm2498_vm2, %v6355_v32, 0.0 }
 0x41d   : > { %2638 = vadd.xlane.f32.xlu0 %v2637_v16  ;;  %v2634_v44 = vsel %vm2498_vm2, %v6357_v4, 0.0 }
 0x41e   : > { %2635 = vadd.xlane.f32.xlu1 %v2634_v44 }
 0x41f   : > { %v6363_v3 = vpop.eup %5311 }
 0x420   : > { %v2640_v5 = vsel %vm2498_vm2, %v6363_v3, 0.0 }
 0x422   : > { %2641 = vadd.xlane.f32.xlu1 %v2640_v5  ;;  %v5171_v5 = vld [vmem:[%s6761_s4 + $0x18] sm:$0xff]  }
 0x479   : > { %v2603_v8 = vpop.xlane.xlu0 %2602 }
 0x47d   : > { %v2615_v49 = vpop.xlane.xlu0 %2614 }
 0x47e   : > { %v2606_v34 = vpop.xlane.xlu1 %2605 }
 0x47f   : > { %5313 = vrcp.f32 %v2606_v34 }
 0x481   : > { %v2597_v9 = vpop.xlane.xlu0 %2596 }
 0x482   : > { %v2618_v15 = vpop.xlane.xlu1 %2617  ;;  %5315 = vrcp.f32 %v2597_v9 }
 0x483   : > { %5317 = vrcp.f32 %v2603_v8  ;;  %v5175_v8 = vld [vmem:[%s6761_s4 + $0x38] sm:$0xff]  }
 0x485   : > { %v2609_v25 = vpop.xlane.xlu0 %2608 }
 0x486   : > { %v2600_v40 = vpop.xlane.xlu1 %2599 }
 0x487   : > { %5319 = vrcp.f32 %v2600_v40 }
 0x488   : > { %5321 = vrcp.f32 %v2618_v15 }
 0x489   : > { %5323 = vrcp.f32 %v2609_v25 }
 0x48a   : > { %5325 = vrcp.f32 %v2615_v49  ;;  %v2612_v43 = vpop.xlane.xlu1 %2611 }
 0x48b   : > { %5327 = vrcp.f32 %v2612_v43 }
 0x48c   : > { %v5314_v59 = vpop.eup %5313 }
 0x48d   : > { %v2662_v14 = vmul.f32 %v5314_v59, %v6301_v2 }
 0x48f   : > { %v5316_v45 = vpop.eup %5315 }
 0x490   : > { %v5318_v17 = vpop.eup %5317  ;;  %v2659_v19 = vmul.f32 %v5316_v45, %v6307_v57  ;;  %v2693_v57 = vpack.c.bf16 %v6169_v27, %v6149_v26 }
 0x491   : > { %v2661_v7 = vmul.f32 %v5318_v17, %v6295_v62  ;;  %v5174_v17 = vld [vmem:[%s6761_s4 + $0x20] sm:$0xff]  }
 0x493   : > { %v2676_v54 = vpack.c.bf16 %v2662_v14, %v2661_v7 }
 0x494   : > { %v5320_v11 = vpop.eup %5319 }
 0x495   : > { %v5322_v53 = vpop.eup %5321  ;;  %v2660_v48 = vmul.f32 %v5320_v11, %v6317_v13 }
 0x496   : > { %v5324_v52 = vpop.eup %5323  ;;  %v2666_v56 = vmul.f32 %v5322_v53, %v6309_v23  ;;  %v2697_v23 = vpack.c.bf16 %v6175_v36, %v6151_v39 }
 0x497   : > { %v5326_v35 = vpop.eup %5325  ;;  %v2675_v28 = vpack.c.bf16 %v2660_v48, %v2659_v19  ;;  %v2663_v29 = vmul.f32 %v5324_v52, %v6315_v33  ;;  %v5176_v19 = vld [vmem:[%s6761_s4 + $0x30] sm:$0xff]  }
 0x498   : > { %v5328_v60 = vpop.eup %5327  ;;  %v2665_v62 = vmul.f32 %v5326_v35, %v6299_v6 }
 0x499   : > { %4911 = vmatprep.mubr.msk.bf16.mxu0 %vm2498_vm2, %v2675_v28  ;;  %v2664_v2 = vmul.f32 %v5328_v60, %v6323_v22 }
 0x49a   : > { %v2627_v12 = vpop.xlane.xlu0 %2626  ;;  %4912 = vmatmul.mubr.msk.bf16.vlgmr.msra.gmra.mxu0 %vm2498_vm2, %v2676_v54  ;;  %v2678_v58 = vpack.c.bf16 %v2666_v56, %v2665_v62 }
 0x49b   : > { %4928 = vmatpush3.bf16.msra.mxu0 %v6153_v30  ;;  %v2677_v13 = vpack.c.bf16 %v2664_v2, %v2663_v29 }
 0x49c   : > { %4929 = vmatprep.subr.bf16.mxu0 %v2693_v57 }
 0x49d   : > { %4923 = vmatprep.mubr.msk.bf16.mxu1 %vm2498_vm2, %v2677_v13 }
 0x49e   : > { %v2621_v33 = vpop.xlane.xlu0 %2620  ;;  %4924 = vmatmul.mubr.msk.bf16.vlgmr.msra.gmra.mxu1 %vm2498_vm2, %v2678_v58 }
 0x49f   : > { %4930 = vmatpush3.bf16.msra.mxu0 %v2693_v57  ;;  %4940 = vmatpush3.bf16.msra.mxu1 %v6155_v41  ;;  %v2630_v26 = vpop.xlane.xlu1 %2629 }
 0x4a0   : > { %4931 = vmatprep.subr.bf16.mxu0 %v6141_v10  ;;  %4941 = vmatprep.subr.bf16.mxu1 %v2697_v23  ;;  %5329 = vrcp.f32 %v2630_v26 }
 0x4a1   : > { %5331 = vrcp.f32 %v2621_v33 }
 0x4a2   : > { %v2633_v30 = vpop.xlane.xlu0 %2632  ;;  %5333 = vrcp.f32 %v2627_v12 }
 0x4a3   : > { %4932 = vmatpush3.bf16.msra.mxu0 %v6141_v10  ;;  %4942 = vmatpush3.bf16.msra.mxu1 %v2697_v23  ;;  %v2624_v27 = vpop.xlane.xlu1 %2623 }
 0x4a4   : > { %5335 = vrcp.f32 %v2624_v27  ;;  %4933 = vmatprep.subr.bf16.mxu0 %v6145_v24  ;;  %4943 = vmatprep.subr.bf16.mxu1 %v6143_v47 }
 0x4a5   : > { %5337 = vrcp.f32 %v2633_v30 }
 0x4a6   : > { %v2639_v39 = vpop.xlane.xlu0 %2638 }
 0x4a7   : > { %4934 = vmatpush3.bf16.msra.mxu0 %v6145_v24  ;;  %4944 = vmatpush3.bf16.msra.mxu1 %v6143_v47  ;;  %v2636_v41 = vpop.xlane.xlu1 %2635 }
 0x4a8   : > { %5339 = vrcp.f32 %v2636_v41  ;;  %4945 = vmatprep.subr.bf16.mxu1 %v6147_v21 }
 0x4a9   : > { %5341 = vrcp.f32 %v2639_v39 }
 0x4ab   : > { %4946 = vmatpush3.bf16.msra.mxu1 %v6147_v21  ;;  %v2642_v10 = vpop.xlane.xlu1 %2641 }
 0x4ac   : > { %5343 = vrcp.f32 %v2642_v10  ;;  %4959 = vmatprep.subr.bf16.mxu1 %v5171_v5 }
 0x4ad   : > { %v5330_v36 = vpop.eup %5329 }
 0x4ae   : > { %v5332_v6 = vpop.eup %5331  ;;  %v2670_v37 = vmul.f32 %v5330_v36, %v6341_v38 }
 0x4af   : > { %v5334_v22 = vpop.eup %5333  ;;  %v2667_v20 = vmul.f32 %v5332_v6, %v6339_v0 }
 0x4b0   : > { %v2669_v63 = vmul.f32 %v5334_v22, %v6335_v18 }
 0x4b1   : > { %v5336_v61 = vpop.eup %5335 }
 0x4b2   : > { %v2668_v24 = vmul.f32 %v5336_v61, %v6349_v51  ;;  %v5338_v47 = vpop.eup %5337  ;;  %v2680_v55 = vpack.c.bf16 %v2670_v37, %v2669_v63 }
 0x4b3   : > { %v2671_v21 = vmul.f32 %v5338_v47, %v6347_v1  ;;  %v5169_v1 = vld [vmem:[%s6761_s4 + $0x8] sm:$0xff]  }
 0x4b4   : > { %v2679_v50 = vpack.c.bf16 %v2668_v24, %v2667_v20  ;;  %4951 = vmatprep.subr.bf16.mxu0 %v5169_v1 }
 0x4b5   : > { %v5340_v46 = vpop.eup %5339 }
 0x4b6   : > { %4935 = vmatprep.mubr.msk.bf16.mxu0 %vm2498_vm2, %v2679_v50  ;;  %v2672_v31 = vmul.f32 %v5340_v46, %v6357_v4  ;;  %v5342_v16 = vpop.eup %5341  ;;  %v5170_v4 = vld [vmem:[%s6761_s4] sm:$0xff]  }
 0x4b7   : > { %4936 = vmatmul.mubr.msk.bf16.vlgmr.msra.gmra.mxu0 %vm2498_vm2, %v2680_v55  ;;  %v2673_v0 = vmul.f32 %v5342_v16, %v6355_v32  ;;  %v5172_v32 = vld [vmem:[%s6761_s4 + $0x10] sm:$0xff]   ;;  %v4252_v55 = vld [vmem:[%s6762_s5] ss:$0 sm:$0xff] }
 0x4b8   : > { %v2681_v38 = vpack.c.bf16 %v2672_v31, %v2671_v21  ;;  %4952 = vmatpush3.bf16.msra.mxu0 %v5169_v1  ;;  %v5353_v1 = vld [vmem:[%s5609_s24] sm:$0xff] }
 0x4b9   : > { %v5344_v44 = vpop.eup %5343  ;;  %4953 = vmatprep.subr.bf16.mxu0 %v5170_v4 }
 0x4ba   : > { %4947 = vmatprep.mubr.msk.bf16.mxu1 %vm2498_vm2, %v2681_v38  ;;  %v2674_v18 = vmul.f32 %v5344_v44, %v6363_v3  ;;  %v5173_v3 = vld [vmem:[%s6761_s4 + $0x28] sm:$0xff]  }
 0x4bc   : > { %v2682_v51 = vpack.c.bf16 %v2674_v18, %v2673_v0  ;;  %4954 = vmatpush3.bf16.msra.mxu0 %v5170_v4 }
 0x4bd   : > { %4967 = vmatprep.subr.bf16.mxu0 %v5173_v3 }
 0x4be   : > { %4948 = vmatmul.mubr.msk.bf16.vlgmr.msra.gmra.mxu1 %vm2498_vm2, %v2682_v51 }
 0x4bf   : > { %4960 = vmatpush3.bf16.msra.mxu1 %v5171_v5 }
 0x4c0   : > { %4961 = vmatprep.subr.bf16.mxu1 %v5172_v32 }
 0x4c3   : > { %4962 = vmatpush3.bf16.msra.mxu1 %v5172_v32 }
 0x4c4   : > { %4975 = vmatprep.subr.bf16.mxu1 %v5175_v8 }
 0x55a   : > { %v4913_v49 = vpop.f32.mrf.mxu0 }
 0x55c   : > { %v2739_v34 = vpop.f32.mrf.mxu0 }
 0x55e   : > { %v4914_v9 = vpop.f32.mrf.mxu0  ;;  %v4925_v15 = vpop.f32.mrf.mxu1 }
 0x55f   : > { %v2920_v59 = vpack.c.bf16 %v4914_v9, %v4913_v49  ;;  %v5355_v49 = vld [vmem:[%s5609_s24 + $0x8] sm:$0xff]  ;;  %v5356_v9 = vld [vmem:[%s5609_s24 + $0x18] sm:$0xff] }
 0x560   : > { %v2742_v25 = vpop.f32.mrf.mxu0  ;;  %v2794_v40 = vpop.f32.mrf.mxu1 }
 0x561   : > { %v2919_v43 = vpack.c.bf16 %v2742_v25, %v2739_v34  ;;  %v5177_v25 = vld [vmem:[%s6767_s10 + $0xe0] ss:$16 sps:$4 sm:$0xff]  }
 0x562   : > { %v4926_v45 = vpop.f32.mrf.mxu1 }
 0x563   : > { %4955 = vmatprep.mubr.msk.bf16.mxu0 %vm2197_vm0, %v2919_v43  ;;  %v2922_v53 = vpack.c.bf16 %v4926_v45, %v4925_v15  ;;  %v5180_v43 = vld [vmem:[%s6767_s10 + $0xe8] ss:$16 sps:$4 sm:$0xff]  }
 0x564   : > { %v2797_v11 = vpop.f32.mrf.mxu1  ;;  %4956 = vmatmul.mubr.msk.bf16.vlgmr.msra.gmra.mxu0 %vm2197_vm0, %v2920_v59  ;;  %v5182_v59 = vld [vmem:[%s6767_s10 + $0xec] ss:$16 sps:$4 sm:$0xff]  }
 0x565   : > { %v2921_v14 = vpack.c.bf16 %v2797_v11, %v2794_v40  ;;  %4968 = vmatpush3.bf16.msra.mxu0 %v5173_v3  ;;  %v5354_v3 = vld [vmem:[%s5609_s24 + $0x10] sm:$0xff]  ;;  %s4321_s24 = sshll.u32 %s5433_s16, 2 }
 0x566   : > { %4969 = vmatprep.subr.bf16.mxu0 %v5174_v17  ;;  %v5179_v40 = vld [vmem:[%s6767_s10 + $0xe4] ss:$16 sps:$4 sm:$0xff]   ;;  %s4032_s26 = sadd.s32 %s4322_s18, %s4321_s24  ;;  %s5357_s24 = scalar_lea.vmem %s6696_s27, 512 }
 0x567   : > { %4963 = vmatprep.mubr.msk.bf16.mxu1 %vm2197_vm0, %v2921_v14  ;;  %s4323_s22 = sshll.u32 %s4032_s26, 7  ;;  %p5358_p13 = scmp.ne.s32.totalorder %s6696_s27, %s5357_s24 }
 0x568   : > { %4964 = vmatmul.mubr.msk.bf16.vlgmr.msra.gmra.mxu1 %vm2197_vm0, %v2922_v53  ;;  %s5452_s18 = smov [#allocation2]  }
 0x569   : > { %4970 = vmatpush3.bf16.msra.mxu0 %v5174_v17  ;;  %4976 = vmatpush3.bf16.msra.mxu1 %v5175_v8  ;;  %p5359_p0 = pnand %p5358_p13, %p5581_p3  ;;  %s5361_s26 = sshll.u32 %s5452_s18, 4  ;;  %s5362_s26 = int_to_ptr.vmem [resolvable:$false] %s5361_s26 }
 0x56a   : > { %4977 = vmatprep.subr.bf16.mxu1 %v5176_v19  ;;  %3520 = vmatprep.subr.bf16.mxu0 %v5179_v40  ;;  %s5363_s0 = scalar_lea.vmem %s5362_s26, 1024  ;;  %p5364_p2 = scmp.lt.s32.totalorder %s6696_s27, %s5362_s26 }
 0x56b   : > { %p5360_p1 = pneg %p5359_p0  ;;  %p5365_p4 = scmp.lt.s32.totalorder %s5363_s0, %s5357_s24 }
 0x56d   : > { %4978 = vmatpush3.bf16.msra.mxu1 %v5176_v19  ;;  %p5366_p5 = por %p5365_p4, %p5364_p2 }
 0x56e   : > { %3573 = vmatprep.subr.bf16.mxu1 %v5182_v59 }
 0x56f   : > { %p5367_p6 = pnand %p5366_p5, %p5360_p1 }
 0x577   : > { %v4937_v48 = vpop.f32.mrf.mxu0 }
 0x579   : > { %v2849_v52 = vpop.f32.mrf.mxu0 }
 0x57b   : > { %v4938_v7 = vpop.f32.mrf.mxu0 }
 0x57c   : > { %v2924_v54 = vpack.c.bf16 %v4938_v7, %v4937_v48 }
 0x57d   : > { %v2852_v35 = vpop.f32.mrf.mxu0 }
 0x57e   : > { %v2923_v28 = vpack.c.bf16 %v2852_v35, %v2849_v52  ;;  %v4949_v60 = vpop.f32.mrf.mxu1 }
 0x580   : > { %v2904_v56 = vpop.f32.mrf.mxu1  ;;  %4971 = vmatprep.mubr.msk.bf16.mxu0 %vm2197_vm0, %v2923_v28 }
 0x581   : > { %4972 = vmatmul.mubr.msk.bf16.vlgmr.msra.gmra.mxu0 %vm2197_vm0, %v2924_v54 }
 0x582   : > { %v4950_v29 = vpop.f32.mrf.mxu1  ;;  %3521 = vmatpush1.bf16.msra.mxu0 %v5177_v25 }
 0x583   : > { %v2926_v12 = vpack.c.bf16 %v4950_v29, %v4949_v60 }
 0x584   : > { %v2907_v2 = vpop.f32.mrf.mxu1 }
 0x585   : > { %v2925_v57 = vpack.c.bf16 %v2907_v2, %v2904_v56 }
 0x587   : > { %4979 = vmatprep.mubr.msk.bf16.mxu1 %vm2197_vm0, %v2925_v57  ;;  %v5185_v57 = vld [vmem:[%s6767_s10 + $0xc4] ss:$16 sps:$4 sm:$0xff]  }
 0x588   : > { %4980 = vmatmul.mubr.msk.bf16.vlgmr.msra.gmra.mxu1 %vm2197_vm0, %v2926_v12  ;;  %v5188_v12 = vld [vmem:[%s6767_s10 + $0xcc] ss:$16 sps:$4 sm:$0xff]   ;;  %3522 = vmatprep.subr.bf16.mxu0 %v5185_v57 }
 0x589   : > { %3574 = vmatpush1.bf16.msra.mxu1 %v5180_v43 }
 0x58a   : > { %3575 = vmatprep.subr.bf16.mxu1 %v5188_v12 }
 0x624   : > { %v4957_v62 = vpop.f32.mrf.mxu0 }
 0x626   : > { %v2995_v13 = vpop.f32.mrf.mxu0 }
 0x628   : > { %v4965_v58 = vpop.f32.mrf.mxu1  ;;  %v4958_v23 = vpop.f32.mrf.mxu0 }
 0x629   : > { %v3217_v36 = vadd.f32 %v4965_v58, %v4957_v62  ;;  %v5183_v62 = vld [vmem:[%s6767_s10 + $0xc0] ss:$16 sps:$4 sm:$0xff]   ;;  %v5191_v58 = vld [vmem:[%s6767_s10 + $0xa4] ss:$16 sps:$4 sm:$0xff]  }
 0x62a   : > { %v3062_v33 = vpop.f32.mrf.mxu1  ;;  %v2998_v26 = vpop.f32.mrf.mxu0  ;;  %3523 = vmatpush1.bf16.msra.mxu0 %v5183_v62 }
 0x62b   : > { %v3211_v6 = vadd.f32 %v3062_v33, %v2995_v13  ;;  %v5186_v13 = vld [vmem:[%s6767_s10 + $0xc8] ss:$16 sps:$4 sm:$0xff]   ;;  %v5189_v33 = vld [vmem:[%s6767_s10 + $0xa0] ss:$16 sps:$4 sm:$0xff]   ;;  %3524 = vmatprep.subr.bf16.mxu0 %v5191_v58 }
 0x62c   : > { %v4966_v27 = vpop.f32.mrf.mxu1  ;;  %3576 = vmatpush1.bf16.msra.mxu1 %v5186_v13  ;;  %v5228_v13 = vld [vmem:[%s6769_s12 + $0xb8] sm:$0xff]   ;;  %v5229_v58 = vld [vmem:[%s6769_s12 + $0x70] sm:$0xff]  }
 0x62d   : > { %v3220_v47 = vadd.f32 %v4966_v27, %v4958_v23  ;;  %v5194_v23 = vld [vmem:[%s6767_s10 + $0xac] ss:$16 sps:$4 sm:$0xff]  }
 0x62e   : > { %v3065_v41 = vpop.f32.mrf.mxu1  ;;  %3577 = vmatprep.subr.bf16.mxu1 %v5194_v23  ;;  %3525 = vmatpush1.bf16.msra.mxu0 %v5189_v33  ;;  %v5200_v27 = vld [vmem:[%s6767_s10 + $0x8c] ss:$16 sps:$4 sm:$0xff]   ;;  %v5231_v33 = vld [vmem:[%s6769_s12 + $0x30] sm:$0xff]  }
 0x62f   : > { %v3214_v63 = vadd.f32 %v3065_v41, %v2998_v26  ;;  %v5192_v26 = vld [vmem:[%s6767_s10 + $0xa8] ss:$16 sps:$4 sm:$0xff]  }
 0x630   : > { %3578 = vmatpush1.bf16.msra.mxu1 %v5192_v26  ;;  %v5198_v41 = vld [vmem:[%s6767_s10 + $0x88] ss:$16 sps:$4 sm:$0xff]   ;;  %v5232_v26 = vld [vmem:[%s6769_s12 + $0xb0] sm:$0xff]  }
 0x631   : > { %3579 = vmatprep.subr.bf16.mxu1 %v5200_v27  ;;  %v5234_v27 = vld [vmem:[%s6769_s12 + $0xe8] sm:$0xff]  }
 0x634   : > { %3580 = vmatpush1.bf16.msra.mxu1 %v5198_v41 }
 0x641   : > { %v4973_v30 = vpop.f32.mrf.mxu0 }
 0x642   : > { %v3218_v61 = vadd.f32 %v4973_v30, %v3217_v36  ;;  %v5197_v30 = vld [vmem:[%s6767_s10 + $0x84] ss:$16 sps:$4 sm:$0xff]   ;;  %v5201_v36 = vld [vmem:[%s6767_s10 + $0x60] ss:$16 sps:$4 sm:$0xff]  }
 0x643   : > { %v3129_v39 = vpop.f32.mrf.mxu0  ;;  %3526 = vmatprep.subr.bf16.mxu0 %v5197_v30  ;;  %v5233_v30 = vld [vmem:[%s6769_s12 + $0x68] sm:$0xff]  }
 0x644   : > { %v3212_v37 = vadd.f32 %v3211_v6, %v3129_v39  ;;  %v5195_v39 = vld [vmem:[%s6767_s10 + $0x80] ss:$16 sps:$4 sm:$0xff]   ;;  %v5204_v6 = vld [vmem:[%s6767_s10 + $0x68] ss:$16 sps:$4 sm:$0xff]  }
 0x645   : > { %v4974_v10 = vpop.f32.mrf.mxu0  ;;  %3527 = vmatpush1.bf16.msra.mxu0 %v5195_v39 }
 0x646   : > { %v3221_v31 = vadd.f32 %v4974_v10, %v3220_v47  ;;  %v5203_v10 = vld [vmem:[%s6767_s10 + $0x64] ss:$16 sps:$4 sm:$0xff]  }
 0x647   : > { %v3132_v20 = vpop.f32.mrf.mxu0  ;;  %3528 = vmatprep.subr.bf16.mxu0 %v5203_v10  ;;  %v5215_v47 = vld [vmem:[%s6767_s10 + $0x24] ss:$16 sps:$4 sm:$0xff]   ;;  %v5235_v10 = vld [vmem:[%s6769_s12 + $0x28] sm:$0xff]  }
 0x648   : > { %v4981_v22 = vpop.f32.mrf.mxu1  ;;  %v3215_v16 = vadd.f32 %v3214_v63, %v3132_v20  ;;  %v5207_v20 = vld [vmem:[%s6767_s10 + $0x40] ss:$16 sps:$4 sm:$0xff]   ;;  %v5218_v63 = vld [vmem:[%s6767_s10 + $0x2c] ss:$16 sps:$4 sm:$0xff]  }
 0x649   : > { %v3219_v50 = vadd.f32 %v4981_v22, %v3218_v61  ;;  %v5206_v22 = vld [vmem:[%s6767_s10 + $0x6c] ss:$16 sps:$4 sm:$0xff]   ;;  %v5209_v61 = vld [vmem:[%s6767_s10 + $0x44] ss:$16 sps:$4 sm:$0xff]   ;;  %3529 = vmatpush1.bf16.msra.mxu0 %v5201_v36 }
 0x64a   : > { %v3196_v24 = vpop.f32.mrf.mxu1  ;;  %3581 = vmatprep.subr.bf16.mxu1 %v5206_v22  ;;  %3530 = vmatprep.subr.bf16.mxu0 %v5209_v61  ;;  %v5236_v36 = vld [vmem:[%s6769_s12 + $0xa8] sm:$0xff]   ;;  %v5238_v22 = vld [vmem:[%s6769_s12 + $0xe0] sm:$0xff]  }
 0x64b   : > { %v3213_v46 = vadd.f32 %v3212_v37, %v3196_v24  ;;  %v3232_v0 = vadd.f32 %v4252_v55, %v3219_v50  ;;  %v5212_v37 = vld [vmem:[%s6767_s10 + $0x4c] ss:$16 sps:$4 sm:$0xff]   ;;  %3582 = vmatpush1.bf16.msra.mxu1 %v5204_v6  ;;  %v5210_v24 = vld [vmem:[%s6767_s10 + $0x48] ss:$16 sps:$4 sm:$0xff]   ;;  %v5451_v50 = vmov 0   ;;  %v5237_v6 = vld [vmem:[%s6769_s12 + $0x60] sm:$0xff]  }
 0x64c   : > { %v4982_v21 = vpop.f32.mrf.mxu1  ;;  %3583 = vmatprep.subr.bf16.mxu1 %v5212_v37  ;;  %3552 = vmatprep.mubr.bf16.mxu0 %v5451_v50  ;;  %v5239_v61 = vld [vmem:[%s6769_s12 + $0x20] sm:$0xff]  }
 0x64d   : > { %v3230_v38 = vadd.f32 %v4252_v55, %v3213_v46  ;;  %v3222_v18 = vadd.f32 %v4982_v21, %v3221_v31  ;;  %v6445_v8 = vadd.f32 %v5354_v3, %v3232_v0  ;;  %3605 = vmatprep.mubr.bf16.mxu1 %v5451_v50  ;;  %3531 = vmatpush1.bf16.msra.mxu0 %v5207_v20  ;;  %v5213_v46 = vld [vmem:[%s6767_s10 + $0x20] ss:$16 sps:$4 sm:$0xff]   ;;  %v5221_v21 = vld [vmem:[%s6767_s10 + $0x4] ss:$16 sps:$4 sm:$0xff]   ;;  %v5224_v31 = vld [vmem:[%s6767_s10 + $0xc] ss:$16 sps:$4 sm:$0xff]  }
 0x64e   : > { %v3199_v44 = vpop.f32.mrf.mxu1  ;;  %3532 = vmatprep.subr.bf16.mxu0 %v5215_v47  ;;  %v5226_v0 = vld [vmem:[%s6769_s12 + $0xf8] sm:$0xff]   ;;  %v5240_v37 = vld [vmem:[%s6769_s12 + $0xa0] sm:$0xff]  }
 0x64f   : > { %v3216_v51 = vadd.f32 %v3215_v16, %v3199_v44  ;;  %v6441_v4 = vadd.f32 %v5353_v1, %v3230_v38  ;;  %v3233_v32 = vadd.f32 %v4252_v55, %v3222_v18  ;;  %3584 = vmatpush1.bf16.msra.mxu1 %v5210_v24  ;;  %v5219_v16 = vld [vmem:[%s6767_s10] ss:$16 sps:$4 sm:$0xff]   ;;  %v5222_v38 = vld [vmem:[%s6767_s10 + $0x8] ss:$16 sps:$4 sm:$0xff]  }
 0x650   : > { %3585 = vmatprep.subr.bf16.mxu1 %v5218_v63  ;;  %v5225_v44 = vld [vmem:[%s6769_s12 + $0x78] sm:$0xff]  }
 0x651   : > { %v3231_v5 = vadd.f32 %v4252_v55, %v3216_v51  ;;  %3240 = vadd.xlane.f32.xlu0 %v6441_v4  ;;  %v6453_v15 = vadd.f32 %v5356_v9, %v3233_v32  ;;  %v5216_v55 = vld [vmem:[%s6767_s10 + $0x28] ss:$16 sps:$4 sm:$0xff]   ;;  %3533 = vmatpush1.bf16.msra.mxu0 %v5213_v46  ;;  %v5246_v46 = vld [vmem:[%s6769_s12 + $0xd0] sm:$0xff]  }
 0x652   : > { %3534 = vmatprep.subr.bf16.mxu0 %v5221_v21  ;;  %v5241_v20 = vld [vmem:[%s6769_s12 + $0x58] sm:$0xff]   ;;  %v5248_v21 = vld [vmem:[%s6769_s12 + $0x90] sm:$0xff]  }
 0x653   : > { %v6448_v34 = vadd.f32 %v5355_v49, %v3231_v5  ;;  %3586 = vmatpush1.bf16.msra.mxu1 %v5216_v55  ;;  %v5242_v24 = vld [vmem:[%s6769_s12 + $0xd8] sm:$0xff]   ;;  %v5247_v55 = vld [vmem:[%s6769_s12 + $0x10] sm:$0xff]  }
 0x654   : > { %3587 = vmatprep.subr.bf16.mxu1 %v5224_v31  ;;  %v5243_v47 = vld [vmem:[%s6769_s12 + $0x18] sm:$0xff]   ;;  %v5249_v31 = vld [vmem:[%s6769_s12 + $0x48] sm:$0xff]  }
 0x655   : > { %3244 = vadd.xlane.f32.xlu0 %v6445_v8  ;;  %3242 = vadd.xlane.f32.xlu1 %v6448_v34  ;;  %v5244_v63 = vld [vmem:[%s6769_s12 + $0x98] sm:$0xff]  }
 0x656   : > { %3535 = vmatpush1.bf16.msra.mxu0 %v5219_v16  ;;  %v5250_v16 = vld [vmem:[%s6769_s12 + $0xc8] sm:$0xff]  }
 0x657   : > { %3588 = vmatpush1.bf16.msra.mxu1 %v5222_v38  ;;  %4527 = vmatprep.subr.bf16.mxu0 %v5225_v44  ;;  %v5251_v38 = vld [vmem:[%s6769_s12 + $0x8] sm:$0xff]  }
 0x658   : > { %4555 = vmatprep.subr.bf16.mxu1 %v5226_v0  ;;  %v5252_v44 = vld [vmem:[%s6769_s12 + $0x88] sm:$0xff]   ;;  %v5253_v0 = vld [vmem:[%s6769_s12 + $0x40] sm:$0xff]  }
 0x659   : > { %3246 = vadd.xlane.f32.xlu1 %v6453_v15 }
 0x6da   : > { %v3241_v45 = vpop.xlane.xlu0 %3240 }
 0x6db   : > { %v3248_v17 = vmul.f32 0.0078125, %v3241_v45 }
 0x6dd   : > { %v6469_v11 = vsub.f32 %v6441_v4, %v3248_v17 }
 0x6de   : > { %v3245_v14 = vpop.xlane.xlu0 %3244  ;;  %v3243_v53 = vpop.xlane.xlu1 %3242 }
 0x6df   : > { %v3250_v19 = vmul.f32 0.0078125, %v3245_v14  ;;  %v3249_v48 = vmul.f32 0.0078125, %v3243_v53  ;;  %v3256_v52 = vmul.f32 %v6469_v11, %v6469_v11  ;;  %v4253_v14 = vld [vmem:[%s6765_s8] ss:$0 sm:$0xff] }
 0x6e1   : > { %v6474_v7 = vsub.f32 %v6445_v8, %v3250_v19  ;;  %v6477_v35 = vsub.f32 %v6448_v34, %v3249_v48  ;;  %3260 = vadd.xlane.f32.xlu0 %v3256_v52 }
 0x6e2   : > { %v3247_v28 = vpop.xlane.xlu1 %3246 }
 0x6e3   : > { %v3251_v60 = vmul.f32 0.0078125, %v3247_v28  ;;  %v3258_v54 = vmul.f32 %v6474_v7, %v6474_v7  ;;  %v3257_v56 = vmul.f32 %v6477_v35, %v6477_v35  ;;  %v4254_v28 = vld [vmem:[%s6766_s9] ss:$0 sm:$0xff] }
 0x6e5   : > { %v6484_v29 = vsub.f32 %v6453_v15, %v3251_v60  ;;  %3264 = vadd.xlane.f32.xlu0 %v3258_v54  ;;  %3262 = vadd.xlane.f32.xlu1 %v3257_v56 }
 0x6e7   : > { %v3259_v2 = vmul.f32 %v6484_v29, %v6484_v29 }
 0x6e9   : > { %3266 = vadd.xlane.f32.xlu1 %v3259_v2 }
 0x76a   : > { %v3261_v18 = vpop.xlane.xlu0 %3260 }
 0x76b   : > { %v3268_v51 = vmul.f32 0.0078125, %v3261_v18  ;;  %v5254_v18 = vld [vmem:[%s6769_s12 + $0xc0] sm:$0xff]  }
 0x76d   : > { %v3272_v1 = vadd.f32 1e-05, %v3268_v51  ;;  %v5255_v51 = vld [vmem:[%s6769_s12] sm:$0xff]  }
 0x76e   : > { %v3265_v5 = vpop.xlane.xlu0 %3264  ;;  %v3263_v32 = vpop.xlane.xlu1 %3262 }
 0x76f   : > { %5345 = vrsqrt.f32 %v3272_v1  ;;  %v3270_v3 = vmul.f32 0.0078125, %v3265_v5  ;;  %v3269_v49 = vmul.f32 0.0078125, %v3263_v32  ;;  %v5256_v1 = vld [vmem:[%s6769_s12 + $0x80] sm:$0xff]   ;;  %v3346_v5 = vsub.s32 1, %v6159_v42 }
 0x770   : > { %v3354_v32 = vsub.s32 3, %v6159_v42 }
 0x771   : > { %v3273_v9 = vadd.f32 1e-05, %v3269_v49  ;;  %v3274_v25 = vadd.f32 1e-05, %v3270_v3  ;;  %v3342_v3 = vsub.s32 0, %v6159_v42  ;;  %v3350_v49 = vsub.s32 2, %v6159_v42 }
 0x772   : > { %v3267_v40 = vpop.xlane.xlu1 %3266 }
 0x773   : > { %v3271_v43 = vmul.f32 0.0078125, %v3267_v40  ;;  %5347 = vrsqrt.f32 %v3273_v9  ;;  %v3338_v9 = vld [vmem:[%s6768_s11] sm:$0xf] }
 0x774   : > { %5349 = vrsqrt.f32 %v3274_v25 }
 0x775   : > { %v3275_v59 = vadd.f32 1e-05, %v3271_v43  ;;  %v3347_v43 = vrot.slane %v3338_v9, %v3346_v5 }
 0x777   : > { %5351 = vrsqrt.f32 %v3275_v59  ;;  %v3355_v59 = vrot.slane %v3338_v9, %v3354_v32 }
 0x77c   : > { %v5346_v45 = vpop.eup %5345 }
 0x77d   : > { %v3280_v17 = vmul.f32 %v5346_v45, %v6469_v11  ;;  %v3343_v45 = vrot.slane %v3338_v9, %v3342_v3 }
 0x77f   : > { %v3290_v48 = vmul.f32 %v4253_v14, %v3280_v17  ;;  %v3351_v17 = vrot.slane %v3338_v9, %v3350_v49 }
 0x780   : > { %v5348_v53 = vpop.eup %5347 }
 0x781   : > { %v3281_v19 = vmul.f32 %v5348_v53, %v6477_v35  ;;  %v5350_v52 = vpop.eup %5349  ;;  %v3300_v2 = vadd.f32 %v4254_v28, %v3290_v48  ;;  %v5227_v35 = vld [vmem:[%s6769_s12 + $0x38] sm:$0xff]  }
 0x782   : > { %v3282_v11 = vmul.f32 %v5350_v52, %v6474_v7 }
 0x783   : > { %v3291_v54 = vmul.f32 %v4253_v14, %v3281_v19 }
 0x784   : > { %v5352_v60 = vpop.eup %5351  ;;  %v3292_v7 = vmul.f32 %v4253_v14, %v3282_v11 }
 0x785   : > { %v3283_v56 = vmul.f32 %v5352_v60, %v6484_v29  ;;  %v3301_v57 = vadd.f32 %v4254_v28, %v3291_v54  ;;  %v5230_v29 = vld [vmem:[%s6769_s12 + $0xf0] sm:$0xff]  }
 0x786   : > { %v3302_v39 = vadd.f32 %v4254_v28, %v3292_v7 }
 0x787   : > { %v3304_v12 = vpack.c.bf16 %v3301_v57, %v3300_v2  ;;  %v3293_v62 = vmul.f32 %v4253_v14, %v3283_v56 }
 0x789   : > { %3553 = vmatmul.mubr.bf16.vlgmr.msra.gmra.mxu0 %v3304_v12  ;;  %3606 = vmatmul.mubr.bf16.vlgmr.msra.gmra.mxu1 %v3304_v12  ;;  %v3303_v23 = vadd.f32 %v4254_v28, %v3293_v62 }
 0x78a   : > { %3562 = vmatprep.mubr.bf16.mxu0 %v5451_v50  ;;  %3615 = vmatprep.mubr.bf16.mxu1 %v5451_v50  ;;  %v5245_v50 = vld [vmem:[%s6769_s12 + $0x50] sm:$0xff]  }
 0x78b   : > { %4528 = vmatpush3.bf16.msra.mxu0 %v5227_v35  ;;  %4556 = vmatpush3.bf16.msra.mxu1 %v5228_v13  ;;  %v3305_v41 = vpack.c.bf16 %v3303_v23, %v3302_v39 }
 0x78c   : > { %4529 = vmatprep.subr.bf16.mxu0 %v5229_v58  ;;  %4557 = vmatprep.subr.bf16.mxu1 %v5230_v29 }
 0x78f   : > { %4530 = vmatpush3.bf16.msra.mxu0 %v5231_v33  ;;  %4558 = vmatpush3.bf16.msra.mxu1 %v5232_v26 }
 0x790   : > { %4531 = vmatprep.subr.bf16.mxu0 %v5233_v30  ;;  %4559 = vmatprep.subr.bf16.mxu1 %v5234_v27 }
 0x791   : > { %3563 = vmatmul.mubr.bf16.gmra.mxu0 %v3305_v41  ;;  %3616 = vmatmul.mubr.bf16.gmra.mxu1 %v3305_v41 }
 0x793   : > { %4532 = vmatpush3.bf16.msra.mxu0 %v5235_v10  ;;  %4560 = vmatpush3.bf16.msra.mxu1 %v5236_v36 }
 0x794   : > { %4533 = vmatprep.subr.bf16.mxu0 %v5237_v6  ;;  %4561 = vmatprep.subr.bf16.mxu1 %v5238_v22 }
 0x797   : > { %4534 = vmatpush3.bf16.msra.mxu0 %v5239_v61  ;;  %4562 = vmatpush3.bf16.msra.mxu1 %v5240_v37 }
 0x798   : > { %4535 = vmatprep.subr.bf16.mxu0 %v5241_v20  ;;  %4563 = vmatprep.subr.bf16.mxu1 %v5242_v24 }
 0x79b   : > { %4536 = vmatpush3.bf16.msra.mxu0 %v5243_v47  ;;  %4564 = vmatpush3.bf16.msra.mxu1 %v5244_v63 }
 0x79c   : > { %4537 = vmatprep.subr.bf16.mxu0 %v5245_v50  ;;  %4565 = vmatprep.subr.bf16.mxu1 %v5246_v46 }
 0x79f   : > { %4538 = vmatpush3.bf16.msra.mxu0 %v5247_v55  ;;  %4566 = vmatpush3.bf16.msra.mxu1 %v5248_v21 }
 0x7a0   : > { %4539 = vmatprep.subr.bf16.mxu0 %v5249_v31  ;;  %4567 = vmatprep.subr.bf16.mxu1 %v5250_v16 }
 0x7a3   : > { %4540 = vmatpush3.bf16.msra.mxu0 %v5251_v38  ;;  %4568 = vmatpush3.bf16.msra.mxu1 %v5252_v44 }
 0x7a4   : > { %4541 = vmatprep.subr.bf16.mxu0 %v5253_v0  ;;  %4569 = vmatprep.subr.bf16.mxu1 %v5254_v18 }
 0x7a7   : > { %4542 = vmatpush3.bf16.msra.mxu0 %v5255_v51  ;;  %4570 = vmatpush3.bf16.msra.mxu1 %v5256_v1 }
 0x849   : > { %v3554_v25 = vpop.f32.mrf.mxu0  ;;  %v3607_v40 = vpop.f32.mrf.mxu1 }
 0x84a   : > { %v3555_v56 = vadd.f32 %v3554_v25, %v3343_v45  ;;  %v3608_v42 = vadd.f32 %v3607_v40, %v3351_v17 }
 0x84b   : > { %v3556_v14 = vpop.f32.mrf.mxu0  ;;  %v3609_v53 = vpop.f32.mrf.mxu1 }
 0x84c   : > { %v3557_v52 = vadd.f32 %v3556_v14, %v3347_v43  ;;  %v3610_v28 = vadd.f32 %v3609_v53, %v3355_v59  ;;  %v3626_v26 = vmax.f32 %v3555_v56, 0.0  ;;  %v3628_v30 = vmax.f32 %v3608_v42, 0.0 }
 0x84d   : > { %v3558_v19 = vpop.f32.mrf.mxu0  ;;  %v3611_v48 = vpop.f32.mrf.mxu1 }
 0x84e   : > { %v3559_v60 = vadd.f32 %v3558_v19, %v3343_v45  ;;  %v3612_v54 = vadd.f32 %v3611_v48, %v3351_v17  ;;  %v3627_v29 = vmax.f32 %v3557_v52, 0.0  ;;  %v3629_v7 = vmax.f32 %v3610_v28, 0.0 }
 0x84f   : > { %v3560_v2 = vpop.f32.mrf.mxu0  ;;  %v3613_v57 = vpop.f32.mrf.mxu1 }
 0x850   : > { %v3561_v11 = vadd.f32 %v3560_v2, %v3347_v43  ;;  %v3614_v12 = vadd.f32 %v3613_v57, %v3355_v59  ;;  %v3630_v62 = vmax.f32 %v3559_v60, 0.0  ;;  %v3632_v35 = vmax.f32 %v3612_v54, 0.0 }
 0x851   : > { %v3564_v13 = vpop.f32.mrf.mxu0  ;;  %v3617_v58 = vpop.f32.mrf.mxu1 }
 0x852   : > { %v3631_v23 = vmax.f32 %v3561_v11, 0.0  ;;  %v3633_v33 = vmax.f32 %v3614_v12, 0.0  ;;  %v3642_v36 = vpack.c.bf16 %v3630_v62, %v3626_v26  ;;  %v3644_v6 = vpack.c.bf16 %v3632_v35, %v3628_v30 }
 0x853   : > { %v3566_v27 = vpop.f32.mrf.mxu0  ;;  %v3619_v39 = vpop.f32.mrf.mxu1  ;;  %v3565_v63 = vadd.f32 %v3564_v13, %v3343_v45  ;;  %v3618_v50 = vadd.f32 %v3617_v58, %v3351_v17 }
 0x854   : > { %v3643_v41 = vpack.c.bf16 %v3631_v23, %v3627_v29  ;;  %v3645_v10 = vpack.c.bf16 %v3633_v33, %v3629_v7  ;;  %v3567_v22 = vadd.f32 %v3566_v27, %v3347_v43  ;;  %v3620_v20 = vadd.f32 %v3619_v39, %v3355_v59 }
 0x855   : > { %v3568_v61 = vpop.f32.mrf.mxu0  ;;  %v3621_v37 = vpop.f32.mrf.mxu1  ;;  %v3634_v1 = vmax.f32 %v3565_v63, 0.0  ;;  %v3636_v5 = vmax.f32 %v3618_v50, 0.0 }
 0x856   : > { %v3569_v24 = vadd.f32 %v3568_v61, %v3343_v45  ;;  %v3622_v47 = vadd.f32 %v3621_v37, %v3351_v17  ;;  %3945 = vmatprep.mubr.bf16.mxu0 %v3643_v41  ;;  %3994 = vmatprep.mubr.bf16.mxu1 %v3645_v10  ;;  %v3635_v44 = vmax.f32 %v3567_v22, 0.0  ;;  %v3637_v0 = vmax.f32 %v3620_v20, 0.0 }
 0x857   : > { %v3570_v46 = vpop.f32.mrf.mxu0  ;;  %v3623_v55 = vpop.f32.mrf.mxu1  ;;  %3946 = vmatmul.mubr.bf16.vlgmr.msra.gmra.mxu0 %v3642_v36  ;;  %3995 = vmatmul.mubr.bf16.vlgmr.msra.gmra.mxu1 %v3644_v6 }
 0x858   : > { %v3571_v21 = vadd.f32 %v3570_v46, %v3347_v43  ;;  %v3624_v31 = vadd.f32 %v3623_v55, %v3355_v59  ;;  %v3638_v16 = vmax.f32 %v3569_v24, 0.0  ;;  %v3640_v38 = vmax.f32 %v3622_v47, 0.0  ;;  %v4287_v43 = vld [vmem:[%s6792_s21] ss:$0 sm:$0xff]  ;;  %s6702_s21 = scalar_lea.hbm %s6794_s28, %s4323_s22 }
 0x85a   : > { %v3639_v18 = vmax.f32 %v3571_v21, 0.0  ;;  %v3641_v51 = vmax.f32 %v3624_v31, 0.0  ;;  %v3646_v49 = vpack.c.bf16 %v3638_v16, %v3634_v1  ;;  %v3648_v9 = vpack.c.bf16 %v3640_v38, %v3636_v5 }
 0x85c   : > { %v3647_v32 = vpack.c.bf16 %v3639_v18, %v3635_v44  ;;  %v3649_v3 = vpack.c.bf16 %v3641_v51, %v3637_v0 }
 0x85e   : > { %3953 = vmatprep.mubr.bf16.mxu0 %v3647_v32  ;;  %4002 = vmatprep.mubr.bf16.mxu1 %v3649_v3 }
 0x85f   : > { %3954 = vmatmul.mubr.bf16.gmra.mxu0 %v3646_v49  ;;  %4003 = vmatmul.mubr.bf16.gmra.mxu1 %v3648_v9 }
 0x917   : > { %v4543_v25 = vpop.f32.mrf.mxu0  ;;  %v4571_v40 = vpop.f32.mrf.mxu1 }
 0x919   : > { %v4544_v59 = vpop.f32.mrf.mxu0  ;;  %v4572_v45 = vpop.f32.mrf.mxu1 }
 0x91a   : > { %v4545_v17 = vadd.f32 %v4544_v59, %v4543_v25  ;;  %v4573_v48 = vadd.f32 %v4572_v45, %v4571_v40 }
 0x91b   : > { %v4546_v14 = vpop.f32.mrf.mxu0  ;;  %v4574_v53 = vpop.f32.mrf.mxu1 }
 0x91c   : > { %v3948_v19 = vadd.f32 %v4545_v17, %v4287_v43 }
 0x91d   : > { %v4547_v52 = vpop.f32.mrf.mxu0  ;;  %v4575_v28 = vpop.f32.mrf.mxu1 }
 0x91e   : > { %v3997_v60 = vadd.f32 %v4573_v48, %v3948_v19  ;;  %v4548_v54 = vadd.f32 %v4547_v52, %v4546_v14  ;;  %v4576_v11 = vadd.f32 %v4575_v28, %v4574_v53 }
 0x91f   : > { %v4549_v56 = vpop.f32.mrf.mxu0  ;;  %v4577_v42 = vpop.f32.mrf.mxu1 }
 0x920   : > { %v4011_v2 = vadd.f32 %v3997_v60, %v6441_v4  ;;  %v3951_v57 = vadd.f32 %v4548_v54, %v4287_v43 }
 0x921   : > { %v4550_v12 = vpop.f32.mrf.mxu0  ;;  %v4578_v62 = vpop.f32.mrf.mxu1 }
 0x922   : > { %4015 = vst [vmem:[%s474_s29] sm:$0xff] %v4011_v2  ;;  %v4000_v35 = vadd.f32 %v4576_v11, %v3951_v57  ;;  %v4551_v13 = vadd.f32 %v4550_v12, %v4549_v56  ;;  %v4579_v33 = vadd.f32 %v4578_v62, %v4577_v42 }
 0x923   : > { %v4552_v58 = vpop.f32.mrf.mxu0  ;;  %v4580_v29 = vpop.f32.mrf.mxu1 }
 0x924   : > { %v4012_v7 = vadd.f32 %v4000_v35, %v6448_v34  ;;  %v3956_v23 = vadd.f32 %v4551_v13, %v4287_v43 }
 0x925   : > { %v4553_v26 = vpop.f32.mrf.mxu0  ;;  %v4581_v30 = vpop.f32.mrf.mxu1 }
 0x926   : > { %4016 = vst [vmem:[%s474_s29 + $0x8] sm:$0xff] %v4012_v7  ;;  %v4005_v4 = vadd.f32 %v4579_v33, %v3956_v23  ;;  %v4554_v27 = vadd.f32 %v4553_v26, %v4552_v58  ;;  %v4582_v10 = vadd.f32 %v4581_v30, %v4580_v29 }
 0x928   : > { %v4013_v39 = vadd.f32 %v4005_v4, %v6445_v8  ;;  %v3959_v41 = vadd.f32 %v4554_v27, %v4287_v43 }
 0x92a   : > { %4017 = vst [vmem:[%s474_s29 + $0x10] sm:$0xff] %v4013_v39  ;;  %v4008_v36 = vadd.f32 %v4582_v10, %v3959_v41 }
 0x92c   : > { %v4014_v34 = vadd.f32 %v4008_v36, %v6453_v15 }
 0x92e   : > { %4018 = vst [vmem:[%s474_s29 + $0x18] sm:$0xff] %v4014_v34 }
 0x92f   : > { %5370 = shalt.err (!%p5367_p6)
}
 0x930   : > { %s5371_s13 = scalar_lea.hbm %s6702_s21, 512  ;;  %s5375_s16 = scalar_lea.hbm %s6794_s28, 2048 }
 0x931   : > { %p5372_p7 = scmp.ne.s32.totalorder %s6702_s21, %s5371_s13  ;;  %p5376_p11 = scmp.lt.s32.totalorder %s6702_s21, %s6794_s28 }
 0x932   : > { %p5377_p12 = scmp.lt.s32.totalorder %s5375_s16, %s5371_s13 }
 0x933   : > { %p5373_p9 = pnand %p5372_p7, %p5581_p3 }
 0x934   : > { %p5378_p13 = por %p5377_p12, %p5376_p11 }
 0x935   : > { %p5374_p10 = pneg %p5373_p9 }
 0x937   : > { %p5379_p0 = pnand %p5378_p13, %p5374_p10 }
 0x939   : > { %5382 = shalt.err (!%p5379_p0)
}
 0x93a   : > { %s5453_s0 = smov 128   ;;  %s5454_s24 = smov 8  }
 0x93b   : > { %4999 = dma.vmem_to_hbm [thread:$0]  (%p5581_p3), %s6696_s27, 512, %s6702_s21, %s6706_s14, %s5453_s0, %s5453_s0, %s5454_s24  }
 0x93c PF: > { %s6795_s26 = sld [smem:[#allocation5_spill]]  ;;  %p5005_p1 = scmp.ge.s32.totalorder %s5449_s20, 2 }
 0x93e   : > { %p5002_p2 = pnand %p5005_p1, %p5590_p8 }
 0x940   : > { %p5003_p4 = pneg %p5002_p2 }
 0x942   : > { %s4050_s22 = sand.u32 1, %s6795_s26  }
 0x943   : > { %s4051_s13 = scalar_lea.sflag [#allocation3], %s4050_s22 }
 0x944   : > { %5416 = dma.done.wait (%p5003_p4), %s4051_s13, 512  }
 0x945   : > { %5418 = vsyncadd (%p5003_p4), %s4051_s13, 4294966784  ;;  %s27_s20 = sadd.s32 1, %s5449_s20   ;;  %s6797_s16 = sld [smem:[#allocation6_spill]] }
 0x946   : > { %p24_p5 = scmp.ge.s32.totalorder %s27_s20, 6   ;;  %s6798_s18 = sld [smem:[#allocation7_spill]] }
 0x947   : > { %s6799_s25 = sld [smem:[#allocation9_spill]]  ;;  %s6800_s29 = smov %s5425_s30 }
 0x948   : > { %s6801_s30 = smov %s5429_s15  ;;  %s6802_s15 = smov %s5599_s23 }
 0x949   : > { %s6803_s17 = smov %s5445_s19  ;;  %26 = sbr.rel (!%p24_p5) target bundleno = 9 (0x9), region = 112 }
 0x94d   : > { %s6804_s19 = smov %s6799_s25 }
 0x94e   :  { %4056 = vsyncpa [#allocation3], 1 }
 0x94f   :  { %4058 = vsyncpa [#allocation3 + $0x1], 1 }

</bundles_post_ra>
